<compile_context>
chip_gen: v5e
topology: v5e:2x2
jax: 0.10.0
libtpu: 0.0.40
codegen_flags: <defaults>
</compile_context>

<pallas_src>
import functools

import jax
import jax.numpy as jnp
from jax.experimental import pallas as pl
from jax.experimental.pallas import tpu as pltpu

LANE = 128


def _round_up(n, m):
    return ((n + m - 1) // m) * m


# ---------------------------------------------------------------------------
# Kernel: one (batch element, row tile) per grid step.
# ---------------------------------------------------------------------------
def _bottleneck_kernel(x_ref, x_hbm_ref, w1_ref, b1_ref, w2_ref, b2_ref,
                       w3_ref, b3_ref, o_ref,
                       h1_ref, halo_top_ref, halo_bot_ref, sem,
                       *, dilation, row_tile, img_h):
    d = dilation
    th = row_tile
    _, _, w, c_in = x_ref.shape                 # main tile (1, th, w, Cin_p) bf16
    p = w1_ref.shape[1]
    dw = d * w
    n_out = th * w

    i = pl.program_id(0)
    j = pl.program_id(1)
    n_h = pl.num_programs(1)

    # ---- kick off the small halo DMAs (top / bottom d rows), clamped so the
    # source stays inside the image; out-of-image halo rows are zeroed below.
    top_start = jnp.maximum(j * th - d, 0)
    bot_start = jnp.minimum((j + 1) * th, img_h - d)
    cp_top = pltpu.make_async_copy(x_hbm_ref.at[i, pl.ds(top_start, d)],
                                   halo_top_ref, sem.at[0])
    cp_bot = pltpu.make_async_copy(x_hbm_ref.at[i, pl.ds(bot_start, d)],
                                   halo_bot_ref, sem.at[1])
    cp_top.start()
    cp_bot.start()

    # ---- conv1 (1x1) + bn1 + relu on the main tile (overlaps the halo DMA) --
    xm = x_ref[0].reshape(n_out, c_in)                         # bf16
    h1_main = jnp.dot(xm, w1_ref[...], preferred_element_type=jnp.float32)
    h1_main = jnp.maximum(h1_main + b1_ref[...], 0.0)
    h1_ref[pl.ds(dw, n_out), :] = h1_main

    # ---- conv1 on the halo rows --------------------------------------------
    cp_top.wait()
    cp_bot.wait()
    ht = halo_top_ref[...].reshape(dw, c_in)
    hb = halo_bot_ref[...].reshape(dw, c_in)
    h1_top = jnp.maximum(
        jnp.dot(ht, w1_ref[...], preferred_element_type=jnp.float32)
        + b1_ref[...], 0.0)
    h1_bot = jnp.maximum(
        jnp.dot(hb, w1_ref[...], preferred_element_type=jnp.float32)
        + b1_ref[...], 0.0)
    h1_ref[pl.ds(0, dw), :] = h1_top
    h1_ref[pl.ds(dw + n_out, dw), :] = h1_bot

    # Halo rows outside the image must be zero (conv2 sees zero padding in H).
    # Only the first / last row tile can have such rows (d <= row_tile).
    @pl.when(j == 0)
    def _():
        h1_ref[pl.ds(0, dw), :] = jnp.zeros((dw, p), jnp.float32)

    @pl.when(j == n_h - 1)
    def _():
        h1_ref[pl.ds(dw + n_out, dw), :] = jnp.zeros((dw, p), jnp.float32)

    # ---- conv2 (3x3, stride 1, pad=d, dilation=d): 9 accumulating matmuls --
    # Column shifts via pltpu.roll (XLU) + static edge masks; the wrap-around
    # positions are exactly the ones masked to zero (conv zero padding in W).
    colf = jax.lax.broadcasted_iota(jnp.int32, (n_out, 1), 0) % w
    left_ok = colf >= d
    right_ok = colf < (w - d)
    acc = jnp.zeros((n_out, p), jnp.float32)
    for ky in range(3):
        slab = h1_ref[pl.ds(ky * dw, n_out), :]                # aligned load, f32
        shifted = (
            jnp.where(left_ok, pltpu.roll(slab, d, axis=0), 0.0),            # kx=0
            slab,                                                            # kx=1
            jnp.where(right_ok, pltpu.roll(slab, n_out - d, axis=0), 0.0),   # kx=2
        )
        for kx in range(3):
            k = ky * 3 + kx
            acc += jnp.dot(shifted[kx].astype(jnp.bfloat16),
                           w2_ref[k * p:(k + 1) * p, :],
                           preferred_element_type=jnp.float32)
    h2 = jnp.maximum(acc + b2_ref[...], 0.0)

    # ---- conv3 (1x1) + bn3 + residual add + relu ----------------------------
    h3 = jnp.dot(h2.astype(jnp.bfloat16), w3_ref[...],
                 preferred_element_type=jnp.float32) + b3_ref[...]
    out = jnp.maximum(h3 + xm.astype(jnp.float32), 0.0)
    o_ref[0] = out.reshape(th, w, o_ref.shape[-1]).astype(o_ref.dtype)


# ---------------------------------------------------------------------------
# NHWC (channel-padded, bf16) entry point — no layout passes.
# ---------------------------------------------------------------------------
def bottleneck_pallas_nhwc(x, params, *, dilation=1, row_tile=8):
    """x: (N, H, W, Cin_p) bf16, channel-padded to 128.  Returns bf16 NHWC."""
    n, h, w, c_in_p = x.shape
    d = dilation
    th = row_tile
    ci_p, p_p = params["w1"].shape
    c_out_p = params["w3"].shape[1]
    assert ci_p == c_in_p, "x channel padding must match prepared weights"
    assert c_in_p == c_out_p, "identity residual requires inplanes == planes*4"
    assert x.dtype == jnp.bfloat16
    assert h % th == 0, "row_tile must divide H"
    assert w % 8 == 0, "W must be a multiple of 8 (sublane-aligned row slabs)"
    assert 1 <= d <= th, "need 1 <= dilation <= row_tile"
    n_h = h // th

    kernel = functools.partial(_bottleneck_kernel, dilation=d, row_tile=th,
                               img_h=h)

    def _full(a):
        return pl.BlockSpec(a.shape, lambda i, j: (0,) * a.ndim)

    return pl.pallas_call(
        kernel,
        out_shape=jax.ShapeDtypeStruct((n, h, w, c_out_p), jnp.bfloat16),
        grid_spec=pltpu.PrefetchScalarGridSpec(
            num_scalar_prefetch=0,
            grid=(n, n_h),
            in_specs=[
                pl.BlockSpec((1, th, w, c_in_p),
                             lambda i, j: (i, j, 0, 0)),      # main tile (bf16)
                pl.BlockSpec(memory_space=pl.ANY),            # x in HBM (halo DMA)
                _full(params["w1"]), _full(params["b1"]),
                _full(params["w2"]), _full(params["b2"]),
                _full(params["w3"]), _full(params["b3"]),
            ],
            out_specs=pl.BlockSpec((1, th, w, c_out_p),
                                   lambda i, j: (i, j, 0, 0)),
            scratch_shapes=[
                pltpu.VMEM(((th + 2 * d) * w, p_p), jnp.float32),  # halo'd h1
                pltpu.VMEM((d, w, c_in_p), jnp.bfloat16),          # top halo
                pltpu.VMEM((d, w, c_in_p), jnp.bfloat16),          # bottom halo
                pltpu.SemaphoreType.DMA((2,)),
            ]),
        compiler_params=pltpu.CompilerParams(
            dimension_semantics=("parallel", "parallel"),
            vmem_limit_bytes=48 * 1024 * 1024),
    )(x, x, params["w1"], params["b1"], params["w2"], params["b2"],
      params["w3"], params["b3"])


# ---------------------------------------------------------------------------
# Drop-in NCHW wrapper (layout conversion only at the block boundary).
# ---------------------------------------------------------------------------
def bottleneck_pallas(x_nchw, params, *, dilation=1, row_tile=8):
    """DRN Bottleneck forward (stride=1, no downsample, identity residual)."""
    # TODO(synk): stride > 1 and the `downsample` branch are not implemented.
    n, c_in, h, w = x_nchw.shape
    c_in_p = params["w1"].shape[0]
    # NCHW -> NHWC, channel pad to 128 lanes, bf16 (halves x HBM traffic).
    x = jnp.transpose(x_nchw, (0, 2, 3, 1)).astype(jnp.bfloat16)
    x = jnp.pad(x, ((0, 0), (0, 0), (0, 0), (0, c_in_p - c_in)))
    out = bottleneck_pallas_nhwc(x, params, dilation=dilation,
                                 row_tile=row_tile)
    # Drop channel padding, back to NCHW in the caller's dtype.
    return jnp.transpose(out[..., :c_in].astype(x_nchw.dtype), (0, 3, 1, 2))


# ---------------------------------------------------------------------------
# Parameter construction (PyTorch-equivalent shapes) and kernel-form prep
# ---------------------------------------------------------------------------
def make_torch_weights(key, inplanes, planes):
    ks = jax.random.split(key, 12)
    w1 = 0.1 * jax.random.normal(ks[0], (planes, inplanes, 1, 1), jnp.float32)
    w2 = 0.1 * jax.random.normal(ks[1], (planes, planes, 3, 3), jnp.float32)
    w3 = 0.1 * jax.random.normal(ks[2], (planes * 4, planes, 1, 1), jnp.float32)

    def bn(k0, k1, k2, c):
        gamma = 1.0 + 0.1 * jax.random.normal(k0, (c,), jnp.float32)
        beta = 0.1 * jax.random.normal(k1, (c,), jnp.float32)
        mean = 0.1 * jax.random.normal(k2, (c,), jnp.float32)
        var = jnp.abs(1.0 + 0.1 * jax.random.normal(jax.random.fold_in(k2, 1),
                                                    (c,), jnp.float32))
        return gamma, beta, mean, var

    bn1 = bn(ks[3], ks[4], ks[5], planes)
    bn2 = bn(ks[6], ks[7], ks[8], planes)
    bn3 = bn(ks[9], ks[10], ks[11], planes * 4)
    return w1, w2, w3, bn1, bn2, bn3


def prepare_params(torch_weights, *, eps=1e-5):
    """Fold frozen BN into the conv weights, pad channels to 128 lanes, cast
    matmul operands to bf16 (f32 accumulation / bias / ReLU stay in-kernel)."""
    w1_t, w2_t, w3_t, bn1, bn2, bn3 = torch_weights
    planes, inplanes = w1_t.shape[0], w1_t.shape[1]
    outplanes = w3_t.shape[0]

    def fold(stats):
        gamma, beta, mean, var = stats
        s = gamma / jnp.sqrt(var + eps)
        return s, beta - mean * s

    s1, b1 = fold(bn1)
    s2, b2 = fold(bn2)
    s3, b3 = fold(bn3)

    p_p = _round_up(planes, LANE)
    ci_p = _round_up(inplanes, LANE)
    co_p = _round_up(outplanes, LANE)

    w1 = jnp.transpose(w1_t[:, :, 0, 0], (1, 0)) * s1[None, :]          # (Cin, P)
    w1 = jnp.pad(w1, ((0, ci_p - inplanes), (0, p_p - planes)))
    w2 = jnp.transpose(w2_t, (2, 3, 1, 0)) * s2[None, None, None, :]    # HWIO
    w2 = jnp.pad(w2, ((0, 0), (0, 0), (0, p_p - planes), (0, p_p - planes)))
    w2 = w2.reshape(9 * p_p, p_p)                                       # (9P, P)
    w3 = jnp.transpose(w3_t[:, :, 0, 0], (1, 0)) * s3[None, :]          # (P, Cout)
    w3 = jnp.pad(w3, ((0, p_p - planes), (0, co_p - outplanes)))

    def pad_bias(b, c_p):
        return jnp.pad(b, (0, c_p - b.shape[0])).reshape(1, c_p)

    return {
        "w1": w1.astype(jnp.bfloat16), "b1": pad_bias(b1, p_p),
        "w2": w2.astype(jnp.bfloat16), "b2": pad_bias(b2, p_p),
        "w3": w3.astype(jnp.bfloat16), "b3": pad_bias(b3, co_p),
    }


# ---------------------------------------------------------------------------
# Pure-JAX reference (mirrors the PyTorch forward, inference-mode BN, f32)
# ---------------------------------------------------------------------------
def bottleneck_ref(x, torch_weights, *, dilation=1, eps=1e-5):
    w1_t, w2_t, w3_t, bn1, bn2, bn3 = torch_weights

    def conv(x, w, padding=0, dil=1):
        return jax.lax.conv_general_dilated(
            x, w, window_strides=(1, 1),
            padding=[(padding, padding), (padding, padding)],
            rhs_dilation=(dil, dil),
            dimension_numbers=("NCHW", "OIHW", "NCHW"))

    def bn(x, stats):
        gamma, beta, mean, var = stats
        s = gamma / jnp.sqrt(var + eps)
        b = beta - mean * s
        return x * s[None, :, None, None] + b[None, :, None, None]

    out = jax.nn.relu(bn(conv(x, w1_t), bn1))
    out = jax.nn.relu(bn(conv(out, w2_t, padding=dilation, dil=dilation), bn2))
    out = bn(conv(out, w3_t), bn3)
    return jax.nn.relu(out + x)


if __name__ == "__main__":
    planes = 4
    inplanes = planes * 4        # identity residual: inplanes == planes * expansion
    n, h, w = 2, 16, 16

    key = jax.random.PRNGKey(0)
    kx, kp = jax.random.split(key)
    x = jax.random.normal(kx, (n, inplanes, h, w), jnp.float32)   # NCHW

    torch_weights = make_torch_weights(kp, inplanes, planes)
    params = prepare_params(torch_weights)

    for dilation in (1, 2):
        fwd = jax.jit(functools.partial(bottleneck_pallas, dilation=dilation,
                                        row_tile=8))
        out = jax.block_until_ready(fwd(x, params))

        ref = bottleneck_ref(x, torch_weights, dilation=dilation)
        assert out.shape == (n, inplanes, h, w)
        err = float(jnp.max(jnp.abs(out - ref)))
        # bf16 activations / MXU operands (f32 accumulation) -> relaxed tol.
        assert jnp.allclose(out, ref, atol=5e-2, rtol=5e-2), (dilation, err)

    print("KERNEL_OK")
</pallas_src>

<mosaic_0001>
module attributes {stable_mosaic.version = 11 : i64} {
  func.func @_bottleneck_kernel(%arg0: i32, %arg1: i32, %arg2: memref<1x8x16x128xbf16, #tpu.memory_space<vmem>>, %arg3: memref<2x16x16x128xbf16, #tpu.memory_space<any>>, %arg4: memref<128x128xbf16, #tpu.memory_space<vmem>>, %arg5: memref<1x128xf32, #tpu.memory_space<vmem>>, %arg6: memref<1152x128xbf16, #tpu.memory_space<vmem>>, %arg7: memref<1x128xf32, #tpu.memory_space<vmem>>, %arg8: memref<128x128xbf16, #tpu.memory_space<vmem>>, %arg9: memref<1x128xf32, #tpu.memory_space<vmem>>, %arg10: memref<1x8x16x128xbf16, #tpu.memory_space<vmem>>, %arg11: memref<160x128xf32, #tpu.memory_space<vmem>>, %arg12: memref<1x16x128xbf16, #tpu.memory_space<vmem>>, %arg13: memref<1x16x128xbf16, #tpu.memory_space<vmem>>, %arg14: memref<2x!tpu.dma_semaphore, #tpu.memory_space<semaphore_mem>>) attributes {dimension_semantics = [#tpu.dimension_semantics<parallel>, #tpu.dimension_semantics<parallel>], iteration_bounds = array<i64: 2, 2>, scalar_prefetch = 0 : i64, scratch_operands = 4 : i64, tpu.core_type = #tpu.core_type<tc>, window_params = [{transform_indices = @transform_0, window_bounds = array<i64: 1, 8, 16, 128>}, {}, {pipeline_mode = #tpu.pipeline_mode<synchronous>, transform_indices = @transform_2, window_bounds = array<i64: 128, 128>}, {pipeline_mode = #tpu.pipeline_mode<synchronous>, transform_indices = @transform_3, window_bounds = array<i64: 1, 128>}, {pipeline_mode = #tpu.pipeline_mode<synchronous>, transform_indices = @transform_4, window_bounds = array<i64: 1152, 128>}, {pipeline_mode = #tpu.pipeline_mode<synchronous>, transform_indices = @transform_5, window_bounds = array<i64: 1, 128>}, {pipeline_mode = #tpu.pipeline_mode<synchronous>, transform_indices = @transform_6, window_bounds = array<i64: 128, 128>}, {pipeline_mode = #tpu.pipeline_mode<synchronous>, transform_indices = @transform_7, window_bounds = array<i64: 1, 128>}, {transform_indices = @transform_8, window_bounds = array<i64: 1, 8, 16, 128>}]} {
    %c8_i32 = arith.constant 8 : i32
    %0 = arith.muli %arg1, %c8_i32 : i32
    %c1_i32 = arith.constant 1 : i32
    %1 = arith.subi %0, %c1_i32 : i32
    %c0_i32 = arith.constant 0 : i32
    %2 = arith.maxsi %1, %c0_i32 : i32
    %c1_i32_0 = arith.constant 1 : i32
    %3 = arith.addi %arg1, %c1_i32_0 : i32
    %c8_i32_1 = arith.constant 8 : i32
    %4 = arith.muli %3, %c8_i32_1 : i32
    %c15_i32 = arith.constant 15 : i32
    %5 = arith.minsi %4, %c15_i32 : i32
    %c0_i32_2 = arith.constant 0 : i32
    %c0_i32_3 = arith.constant 0 : i32
    %c0_i32_4 = arith.constant 0 : i32
    %6 = tpu.memref_slice %arg3[%arg0, %2, %c0_i32_3, %c0_i32_4] : memref<2x16x16x128xbf16, #tpu.memory_space<any>> -> memref<1x1x16x128xbf16, #tpu.memory_space<any>>
    %7 = tpu.memref_squeeze %6 : memref<1x1x16x128xbf16, #tpu.memory_space<any>> -> memref<1x16x128xbf16, #tpu.memory_space<any>>
    %8 = tpu.memref_slice %arg14[%c0_i32_2] : memref<2x!tpu.dma_semaphore, #tpu.memory_space<semaphore_mem>> -> memref<1x!tpu.dma_semaphore, #tpu.memory_space<semaphore_mem>>
    %9 = tpu.memref_squeeze %8 : memref<1x!tpu.dma_semaphore, #tpu.memory_space<semaphore_mem>> -> memref<!tpu.dma_semaphore, #tpu.memory_space<semaphore_mem>>
    tpu.enqueue_dma source(%7 : memref<1x16x128xbf16, #tpu.memory_space<any>>) target(%arg12 : memref<1x16x128xbf16, #tpu.memory_space<vmem>>) target_semaphore(%9 : memref<!tpu.dma_semaphore, #tpu.memory_space<semaphore_mem>>)
    %c1_i32_5 = arith.constant 1 : i32
    %c0_i32_6 = arith.constant 0 : i32
    %c0_i32_7 = arith.constant 0 : i32
    %10 = tpu.memref_slice %arg3[%arg0, %5, %c0_i32_6, %c0_i32_7] : memref<2x16x16x128xbf16, #tpu.memory_space<any>> -> memref<1x1x16x128xbf16, #tpu.memory_space<any>>
    %11 = tpu.memref_squeeze %10 : memref<1x1x16x128xbf16, #tpu.memory_space<any>> -> memref<1x16x128xbf16, #tpu.memory_space<any>>
    %12 = tpu.memref_slice %arg14[%c1_i32_5] : memref<2x!tpu.dma_semaphore, #tpu.memory_space<semaphore_mem>> -> memref<1x!tpu.dma_semaphore, #tpu.memory_space<semaphore_mem>>
    %13 = tpu.memref_squeeze %12 : memref<1x!tpu.dma_semaphore, #tpu.memory_space<semaphore_mem>> -> memref<!tpu.dma_semaphore, #tpu.memory_space<semaphore_mem>>
    tpu.enqueue_dma source(%11 : memref<1x16x128xbf16, #tpu.memory_space<any>>) target(%arg13 : memref<1x16x128xbf16, #tpu.memory_space<vmem>>) target_semaphore(%13 : memref<!tpu.dma_semaphore, #tpu.memory_space<semaphore_mem>>)
    %c0 = arith.constant 0 : index
    %c0_8 = arith.constant 0 : index
    %c0_9 = arith.constant 0 : index
    %c0_10 = arith.constant 0 : index
    %14 = vector.load %arg2[%c0, %c0_8, %c0_9, %c0_10] : memref<1x8x16x128xbf16, #tpu.memory_space<vmem>>, vector<1x8x16x128xbf16>
    %15 = vector.shape_cast %14 : vector<1x8x16x128xbf16> to vector<8x16x128xbf16>
    %16 = vector.shape_cast %15 : vector<8x16x128xbf16> to vector<128x128xbf16>
    %c0_11 = arith.constant 0 : index
    %c0_12 = arith.constant 0 : index
    %17 = vector.load %arg4[%c0_11, %c0_12] : memref<128x128xbf16, #tpu.memory_space<vmem>>, vector<128x128xbf16>
    %cst = arith.constant dense<0.000000e+00> : vector<128x128xf32>
    %18 = tpu.matmul %16, %17, %cst {dimension_numbers = #tpu.dot_dimension_numbers<[1], [0], [0], [1], [0, 0, 1, 1], [], []>} : vector<128x128xbf16>, vector<128x128xbf16>, vector<128x128xf32> -> vector<128x128xf32>
    %c0_13 = arith.constant 0 : index
    %c0_14 = arith.constant 0 : index
    %19 = vector.load %arg5[%c0_13, %c0_14] : memref<1x128xf32, #tpu.memory_space<vmem>>, vector<1x128xf32>
    %20 = vector.broadcast %19 : vector<1x128xf32> to vector<128x128xf32>
    %21 = arith.addf %18, %20 : vector<128x128xf32>
    %cst_15 = arith.constant 0.000000e+00 : f32
    %22 = vector.broadcast %cst_15 : f32 to vector<128x128xf32>
    %23 = arith.maximumf %21, %22 : vector<128x128xf32>
    %c16 = arith.constant 16 : index
    %c0_16 = arith.constant 0 : index
    %24 = vector.load %arg11[%c16, %c0_16] : memref<160x128xf32, #tpu.memory_space<vmem>>, vector<128x128xf32>
    tpu.vector_store %arg11[%c16, %c0_16], %23 {strides = array<i32>} : memref<160x128xf32, #tpu.memory_space<vmem>>, vector<128x128xf32>,
    %c0_i32_17 = arith.constant 0 : i32
    %c0_i32_18 = arith.constant 0 : i32
    %c0_i32_19 = arith.constant 0 : i32
    %25 = tpu.memref_slice %arg3[%arg0, %2, %c0_i32_18, %c0_i32_19] : memref<2x16x16x128xbf16, #tpu.memory_space<any>> -> memref<1x1x16x128xbf16, #tpu.memory_space<any>>
    %26 = tpu.memref_squeeze %25 : memref<1x1x16x128xbf16, #tpu.memory_space<any>> -> memref<1x16x128xbf16, #tpu.memory_space<any>>
    %27 = tpu.memref_slice %arg14[%c0_i32_17] : memref<2x!tpu.dma_semaphore, #tpu.memory_space<semaphore_mem>> -> memref<1x!tpu.dma_semaphore, #tpu.memory_space<semaphore_mem>>
    %28 = tpu.memref_squeeze %27 : memref<1x!tpu.dma_semaphore, #tpu.memory_space<semaphore_mem>> -> memref<!tpu.dma_semaphore, #tpu.memory_space<semaphore_mem>>
    tpu.wait_dma2 semaphore(%28 : memref<!tpu.dma_semaphore, #tpu.memory_space<semaphore_mem>>) src(%26 : memref<1x16x128xbf16, #tpu.memory_space<any>>) dst(%arg12 : memref<1x16x128xbf16, #tpu.memory_space<vmem>>)
    %c1_i32_20 = arith.constant 1 : i32
    %c0_i32_21 = arith.constant 0 : i32
    %c0_i32_22 = arith.constant 0 : i32
    %29 = tpu.memref_slice %arg3[%arg0, %5, %c0_i32_21, %c0_i32_22] : memref<2x16x16x128xbf16, #tpu.memory_space<any>> -> memref<1x1x16x128xbf16, #tpu.memory_space<any>>
    %30 = tpu.memref_squeeze %29 : memref<1x1x16x128xbf16, #tpu.memory_space<any>> -> memref<1x16x128xbf16, #tpu.memory_space<any>>
    %31 = tpu.memref_slice %arg14[%c1_i32_20] : memref<2x!tpu.dma_semaphore, #tpu.memory_space<semaphore_mem>> -> memref<1x!tpu.dma_semaphore, #tpu.memory_space<semaphore_mem>>
    %32 = tpu.memref_squeeze %31 : memref<1x!tpu.dma_semaphore, #tpu.memory_space<semaphore_mem>> -> memref<!tpu.dma_semaphore, #tpu.memory_space<semaphore_mem>>
    tpu.wait_dma2 semaphore(%32 : memref<!tpu.dma_semaphore, #tpu.memory_space<semaphore_mem>>) src(%30 : memref<1x16x128xbf16, #tpu.memory_space<any>>) dst(%arg13 : memref<1x16x128xbf16, #tpu.memory_space<vmem>>)
    %c0_23 = arith.constant 0 : index
    %c0_24 = arith.constant 0 : index
    %c0_25 = arith.constant 0 : index
    %33 = vector.load %arg12[%c0_23, %c0_24, %c0_25] : memref<1x16x128xbf16, #tpu.memory_space<vmem>>, vector<1x16x128xbf16>
    %34 = vector.shape_cast %33 : vector<1x16x128xbf16> to vector<16x128xbf16>
    %c0_26 = arith.constant 0 : index
    %c0_27 = arith.constant 0 : index
    %c0_28 = arith.constant 0 : index
    %35 = vector.load %arg13[%c0_26, %c0_27, %c0_28] : memref<1x16x128xbf16, #tpu.memory_space<vmem>>, vector<1x16x128xbf16>
    %36 = vector.shape_cast %35 : vector<1x16x128xbf16> to vector<16x128xbf16>
    %c0_29 = arith.constant 0 : index
    %c0_30 = arith.constant 0 : index
    %37 = vector.load %arg4[%c0_29, %c0_30] : memref<128x128xbf16, #tpu.memory_space<vmem>>, vector<128x128xbf16>
    %cst_31 = arith.constant dense<0.000000e+00> : vector<16x128xf32>
    %38 = tpu.matmul %34, %37, %cst_31 {dimension_numbers = #tpu.dot_dimension_numbers<[1], [0], [0], [1], [0, 0, 1, 1], [], []>} : vector<16x128xbf16>, vector<128x128xbf16>, vector<16x128xf32> -> vector<16x128xf32>
    %c0_32 = arith.constant 0 : index
    %c0_33 = arith.constant 0 : index
    %39 = vector.load %arg5[%c0_32, %c0_33] : memref<1x128xf32, #tpu.memory_space<vmem>>, vector<1x128xf32>
    %40 = vector.broadcast %39 : vector<1x128xf32> to vector<16x128xf32>
    %41 = arith.addf %38, %40 : vector<16x128xf32>
    %cst_34 = arith.constant 0.000000e+00 : f32
    %42 = vector.broadcast %cst_34 : f32 to vector<16x128xf32>
    %43 = arith.maximumf %41, %42 : vector<16x128xf32>
    %c0_35 = arith.constant 0 : index
    %c0_36 = arith.constant 0 : index
    %44 = vector.load %arg4[%c0_35, %c0_36] : memref<128x128xbf16, #tpu.memory_space<vmem>>, vector<128x128xbf16>
    %cst_37 = arith.constant dense<0.000000e+00> : vector<16x128xf32>
    %45 = tpu.matmul %36, %44, %cst_37 {dimension_numbers = #tpu.dot_dimension_numbers<[1], [0], [0], [1], [0, 0, 1, 1], [], []>} : vector<16x128xbf16>, vector<128x128xbf16>, vector<16x128xf32> -> vector<16x128xf32>
    %c0_38 = arith.constant 0 : index
    %c0_39 = arith.constant 0 : index
    %46 = vector.load %arg5[%c0_38, %c0_39] : memref<1x128xf32, #tpu.memory_space<vmem>>, vector<1x128xf32>
    %47 = vector.broadcast %46 : vector<1x128xf32> to vector<16x128xf32>
    %48 = arith.addf %45, %47 : vector<16x128xf32>
    %cst_40 = arith.constant 0.000000e+00 : f32
    %49 = vector.broadcast %cst_40 : f32 to vector<16x128xf32>
    %50 = arith.maximumf %48, %49 : vector<16x128xf32>
    %c0_41 = arith.constant 0 : index
    %c0_42 = arith.constant 0 : index
    %51 = vector.load %arg11[%c0_41, %c0_42] : memref<160x128xf32, #tpu.memory_space<vmem>>, vector<16x128xf32>
    tpu.vector_store %arg11[%c0_41, %c0_42], %43 {strides = array<i32>} : memref<160x128xf32, #tpu.memory_space<vmem>>, vector<16x128xf32>,
    %c144 = arith.constant 144 : index
    %c0_43 = arith.constant 0 : index
    %52 = vector.load %arg11[%c144, %c0_43] : memref<160x128xf32, #tpu.memory_space<vmem>>, vector<16x128xf32>
    tpu.vector_store %arg11[%c144, %c0_43], %50 {strides = array<i32>} : memref<160x128xf32, #tpu.memory_space<vmem>>, vector<16x128xf32>,
    %c0_i32_44 = arith.constant 0 : i32
    %53 = arith.cmpi eq, %arg1, %c0_i32_44 : i32
    %54 = arith.extui %53 : i1 to i32
    %c0_i32_45 = arith.constant 0 : i32
    %55 = arith.cmpi ne, %54, %c0_i32_45 : i32
    scf.if %55 {
      %cst_104 = arith.constant 0.000000e+00 : f32
      %170 = vector.broadcast %cst_104 : f32 to vector<16x128xf32>
      %c0_105 = arith.constant 0 : index
      %c0_106 = arith.constant 0 : index
      %171 = vector.load %arg11[%c0_105, %c0_106] : memref<160x128xf32, #tpu.memory_space<vmem>>, vector<16x128xf32>
      tpu.vector_store %arg11[%c0_105, %c0_106], %170 {strides = array<i32>} : memref<160x128xf32, #tpu.memory_space<vmem>>, vector<16x128xf32>,
    } else {
    }
    %c1_i32_46 = arith.constant 1 : i32
    %56 = arith.cmpi eq, %arg1, %c1_i32_46 : i32
    %57 = arith.extui %56 : i1 to i32
    %c0_i32_47 = arith.constant 0 : i32
    %58 = arith.cmpi ne, %57, %c0_i32_47 : i32
    scf.if %58 {
      %cst_104 = arith.constant 0.000000e+00 : f32
      %170 = vector.broadcast %cst_104 : f32 to vector<16x128xf32>
      %c144_105 = arith.constant 144 : index
      %c0_106 = arith.constant 0 : index
      %171 = vector.load %arg11[%c144_105, %c0_106] : memref<160x128xf32, #tpu.memory_space<vmem>>, vector<16x128xf32>
      tpu.vector_store %arg11[%c144_105, %c0_106], %170 {strides = array<i32>} : memref<160x128xf32, #tpu.memory_space<vmem>>, vector<16x128xf32>,
    } else {
    }
    %59 = tpu.iota {dimensions = array<i32: 0>} : vector<128x1xi32>
    %c16_i32 = arith.constant 16 : i32
    %c0_i32_48 = arith.constant 0 : i32
    %60 = arith.cmpi eq, %c16_i32, %c0_i32_48 : i32
    %c1_i32_49 = arith.constant 1 : i32
    %61 = arith.select %60, %c1_i32_49, %c16_i32 : i32
    %62 = vector.broadcast %61 : i32 to vector<128x1xi32>
    %63 = arith.remsi %59, %62 : vector<128x1xi32>
    %c0_i32_50 = arith.constant 0 : i32
    %64 = vector.broadcast %c0_i32_50 : i32 to vector<128x1xi32>
    %65 = arith.cmpi ne, %63, %64 : vector<128x1xi32>
    %c0_i32_51 = arith.constant 0 : i32
    %66 = vector.broadcast %c0_i32_51 : i32 to vector<128x1xi32>
    %67 = arith.cmpi slt, %63, %66 : vector<128x1xi32>
    %c0_i32_52 = arith.constant 0 : i32
    %68 = arith.cmpi slt, %61, %c0_i32_52 : i32
    %69 = vector.broadcast %68 : i1 to vector<128x1xi1>
    %70 = vector.broadcast %69 : vector<128x1xi1> to vector<128x1xi1>
    %71 = arith.xori %67, %70 : vector<128x1xi1>
    %72 = arith.andi %71, %65 : vector<128x1xi1>
    %73 = vector.broadcast %61 : i32 to vector<128x1xi32>
    %74 = arith.addi %63, %73 : vector<128x1xi32>
    %75 = arith.select %72, %74, %63 : vector<128x1xi1>, vector<128x1xi32>
    %c1_i32_53 = arith.constant 1 : i32
    %76 = vector.broadcast %c1_i32_53 : i32 to vector<128x1xi32>
    %77 = arith.cmpi sge, %75, %76 : vector<128x1xi32>
    %c15_i32_54 = arith.constant 15 : i32
    %78 = vector.broadcast %c15_i32_54 : i32 to vector<128x1xi32>
    %79 = arith.cmpi slt, %75, %78 : vector<128x1xi32>
    %cst_55 = arith.constant 0.000000e+00 : f32
    %80 = vector.broadcast %cst_55 : f32 to vector<128x128xf32>
    %c0_56 = arith.constant 0 : index
    %c0_57 = arith.constant 0 : index
    %81 = vector.load %arg11[%c0_56, %c0_57] : memref<160x128xf32, #tpu.memory_space<vmem>>, vector<128x128xf32>
    %c1_i32_58 = arith.constant 1 : i32
    %82 = tpu.dynamic_rotate %81 by %c1_i32_58 dim 0 : vector<128x128xf32>, i32 -> vector<128x128xf32>
    %cst_59 = arith.constant 0.000000e+00 : f32
    %83 = vector.shape_cast %77 : vector<128x1xi1> to vector<128x1xi1>
    %84 = vector.broadcast %83 : vector<128x1xi1> to vector<128x128xi1>
    %85 = vector.broadcast %cst_59 : f32 to vector<128x128xf32>
    %86 = arith.select %84, %82, %85 : vector<128x128xi1>, vector<128x128xf32>
    %c127_i32 = arith.constant 127 : i32
    %87 = tpu.dynamic_rotate %81 by %c127_i32 dim 0 : vector<128x128xf32>, i32 -> vector<128x128xf32>
    %cst_60 = arith.constant 0.000000e+00 : f32
    %88 = vector.shape_cast %79 : vector<128x1xi1> to vector<128x1xi1>
    %89 = vector.broadcast %88 : vector<128x1xi1> to vector<128x128xi1>
    %90 = vector.broadcast %cst_60 : f32 to vector<128x128xf32>
    %91 = arith.select %89, %87, %90 : vector<128x128xi1>, vector<128x128xf32>
    %92 = arith.truncf %86 : vector<128x128xf32> to vector<128x128xbf16>
    %c0_61 = arith.constant 0 : index
    %c0_62 = arith.constant 0 : index
    %93 = vector.load %arg6[%c0_61, %c0_62] : memref<1152x128xbf16, #tpu.memory_space<vmem>>, vector<128x128xbf16>
    %cst_63 = arith.constant dense<0.000000e+00> : vector<128x128xf32>
    %94 = tpu.matmul %92, %93, %cst_63 {dimension_numbers = #tpu.dot_dimension_numbers<[1], [0], [0], [1], [0, 0, 1, 1], [], []>} : vector<128x128xbf16>, vector<128x128xbf16>, vector<128x128xf32> -> vector<128x128xf32>
    %95 = arith.addf %80, %94 : vector<128x128xf32>
    %96 = arith.truncf %81 : vector<128x128xf32> to vector<128x128xbf16>
    %c128 = arith.constant 128 : index
    %c0_64 = arith.constant 0 : index
    %97 = vector.load %arg6[%c128, %c0_64] : memref<1152x128xbf16, #tpu.memory_space<vmem>>, vector<128x128xbf16>
    %cst_65 = arith.constant dense<0.000000e+00> : vector<128x128xf32>
    %98 = tpu.matmul %96, %97, %cst_65 {dimension_numbers = #tpu.dot_dimension_numbers<[1], [0], [0], [1], [0, 0, 1, 1], [], []>} : vector<128x128xbf16>, vector<128x128xbf16>, vector<128x128xf32> -> vector<128x128xf32>
    %99 = arith.addf %95, %98 : vector<128x128xf32>
    %100 = arith.truncf %91 : vector<128x128xf32> to vector<128x128xbf16>
    %c256 = arith.constant 256 : index
    %c0_66 = arith.constant 0 : index
    %101 = vector.load %arg6[%c256, %c0_66] : memref<1152x128xbf16, #tpu.memory_space<vmem>>, vector<128x128xbf16>
    %cst_67 = arith.constant dense<0.000000e+00> : vector<128x128xf32>
    %102 = tpu.matmul %100, %101, %cst_67 {dimension_numbers = #tpu.dot_dimension_numbers<[1], [0], [0], [1], [0, 0, 1, 1], [], []>} : vector<128x128xbf16>, vector<128x128xbf16>, vector<128x128xf32> -> vector<128x128xf32>
    %103 = arith.addf %99, %102 : vector<128x128xf32>
    %c16_68 = arith.constant 16 : index
    %c0_69 = arith.constant 0 : index
    %104 = vector.load %arg11[%c16_68, %c0_69] : memref<160x128xf32, #tpu.memory_space<vmem>>, vector<128x128xf32>
    %c1_i32_70 = arith.constant 1 : i32
    %105 = tpu.dynamic_rotate %104 by %c1_i32_70 dim 0 : vector<128x128xf32>, i32 -> vector<128x128xf32>
    %cst_71 = arith.constant 0.000000e+00 : f32
    %106 = vector.shape_cast %77 : vector<128x1xi1> to vector<128x1xi1>
    %107 = vector.broadcast %106 : vector<128x1xi1> to vector<128x128xi1>
    %108 = vector.broadcast %cst_71 : f32 to vector<128x128xf32>
    %109 = arith.select %107, %105, %108 : vector<128x128xi1>, vector<128x128xf32>
    %c127_i32_72 = arith.constant 127 : i32
    %110 = tpu.dynamic_rotate %104 by %c127_i32_72 dim 0 : vector<128x128xf32>, i32 -> vector<128x128xf32>
    %cst_73 = arith.constant 0.000000e+00 : f32
    %111 = vector.shape_cast %79 : vector<128x1xi1> to vector<128x1xi1>
    %112 = vector.broadcast %111 : vector<128x1xi1> to vector<128x128xi1>
    %113 = vector.broadcast %cst_73 : f32 to vector<128x128xf32>
    %114 = arith.select %112, %110, %113 : vector<128x128xi1>, vector<128x128xf32>
    %115 = arith.truncf %109 : vector<128x128xf32> to vector<128x128xbf16>
    %c384 = arith.constant 384 : index
    %c0_74 = arith.constant 0 : index
    %116 = vector.load %arg6[%c384, %c0_74] : memref<1152x128xbf16, #tpu.memory_space<vmem>>, vector<128x128xbf16>
    %cst_75 = arith.constant dense<0.000000e+00> : vector<128x128xf32>
    %117 = tpu.matmul %115, %116, %cst_75 {dimension_numbers = #tpu.dot_dimension_numbers<[1], [0], [0], [1], [0, 0, 1, 1], [], []>} : vector<128x128xbf16>, vector<128x128xbf16>, vector<128x128xf32> -> vector<128x128xf32>
    %118 = arith.addf %103, %117 : vector<128x128xf32>
    %119 = arith.truncf %104 : vector<128x128xf32> to vector<128x128xbf16>
    %c512 = arith.constant 512 : index
    %c0_76 = arith.constant 0 : index
    %120 = vector.load %arg6[%c512, %c0_76] : memref<1152x128xbf16, #tpu.memory_space<vmem>>, vector<128x128xbf16>
    %cst_77 = arith.constant dense<0.000000e+00> : vector<128x128xf32>
    %121 = tpu.matmul %119, %120, %cst_77 {dimension_numbers = #tpu.dot_dimension_numbers<[1], [0], [0], [1], [0, 0, 1, 1], [], []>} : vector<128x128xbf16>, vector<128x128xbf16>, vector<128x128xf32> -> vector<128x128xf32>
    %122 = arith.addf %118, %121 : vector<128x128xf32>
    %123 = arith.truncf %114 : vector<128x128xf32> to vector<128x128xbf16>
    %c640 = arith.constant 640 : index
    %c0_78 = arith.constant 0 : index
    %124 = vector.load %arg6[%c640, %c0_78] : memref<1152x128xbf16, #tpu.memory_space<vmem>>, vector<128x128xbf16>
    %cst_79 = arith.constant dense<0.000000e+00> : vector<128x128xf32>
    %125 = tpu.matmul %123, %124, %cst_79 {dimension_numbers = #tpu.dot_dimension_numbers<[1], [0], [0], [1], [0, 0, 1, 1], [], []>} : vector<128x128xbf16>, vector<128x128xbf16>, vector<128x128xf32> -> vector<128x128xf32>
    %126 = arith.addf %122, %125 : vector<128x128xf32>
    %c32 = arith.constant 32 : index
    %c0_80 = arith.constant 0 : index
    %127 = vector.load %arg11[%c32, %c0_80] : memref<160x128xf32, #tpu.memory_space<vmem>>, vector<128x128xf32>
    %c1_i32_81 = arith.constant 1 : i32
    %128 = tpu.dynamic_rotate %127 by %c1_i32_81 dim 0 : vector<128x128xf32>, i32 -> vector<128x128xf32>
    %cst_82 = arith.constant 0.000000e+00 : f32
    %129 = vector.shape_cast %77 : vector<128x1xi1> to vector<128x1xi1>
    %130 = vector.broadcast %129 : vector<128x1xi1> to vector<128x128xi1>
    %131 = vector.broadcast %cst_82 : f32 to vector<128x128xf32>
    %132 = arith.select %130, %128, %131 : vector<128x128xi1>, vector<128x128xf32>
    %c127_i32_83 = arith.constant 127 : i32
    %133 = tpu.dynamic_rotate %127 by %c127_i32_83 dim 0 : vector<128x128xf32>, i32 -> vector<128x128xf32>
    %cst_84 = arith.constant 0.000000e+00 : f32
    %134 = vector.shape_cast %79 : vector<128x1xi1> to vector<128x1xi1>
    %135 = vector.broadcast %134 : vector<128x1xi1> to vector<128x128xi1>
    %136 = vector.broadcast %cst_84 : f32 to vector<128x128xf32>
    %137 = arith.select %135, %133, %136 : vector<128x128xi1>, vector<128x128xf32>
    %138 = arith.truncf %132 : vector<128x128xf32> to vector<128x128xbf16>
    %c768 = arith.constant 768 : index
    %c0_85 = arith.constant 0 : index
    %139 = vector.load %arg6[%c768, %c0_85] : memref<1152x128xbf16, #tpu.memory_space<vmem>>, vector<128x128xbf16>
    %cst_86 = arith.constant dense<0.000000e+00> : vector<128x128xf32>
    %140 = tpu.matmul %138, %139, %cst_86 {dimension_numbers = #tpu.dot_dimension_numbers<[1], [0], [0], [1], [0, 0, 1, 1], [], []>} : vector<128x128xbf16>, vector<128x128xbf16>, vector<128x128xf32> -> vector<128x128xf32>
    %141 = arith.addf %126, %140 : vector<128x128xf32>
    %142 = arith.truncf %127 : vector<128x128xf32> to vector<128x128xbf16>
    %c896 = arith.constant 896 : index
    %c0_87 = arith.constant 0 : index
    %143 = vector.load %arg6[%c896, %c0_87] : memref<1152x128xbf16, #tpu.memory_space<vmem>>, vector<128x128xbf16>
    %cst_88 = arith.constant dense<0.000000e+00> : vector<128x128xf32>
    %144 = tpu.matmul %142, %143, %cst_88 {dimension_numbers = #tpu.dot_dimension_numbers<[1], [0], [0], [1], [0, 0, 1, 1], [], []>} : vector<128x128xbf16>, vector<128x128xbf16>, vector<128x128xf32> -> vector<128x128xf32>
    %145 = arith.addf %141, %144 : vector<128x128xf32>
    %146 = arith.truncf %137 : vector<128x128xf32> to vector<128x128xbf16>
    %c1024 = arith.constant 1024 : index
    %c0_89 = arith.constant 0 : index
    %147 = vector.load %arg6[%c1024, %c0_89] : memref<1152x128xbf16, #tpu.memory_space<vmem>>, vector<128x128xbf16>
    %cst_90 = arith.constant dense<0.000000e+00> : vector<128x128xf32>
    %148 = tpu.matmul %146, %147, %cst_90 {dimension_numbers = #tpu.dot_dimension_numbers<[1], [0], [0], [1], [0, 0, 1, 1], [], []>} : vector<128x128xbf16>, vector<128x128xbf16>, vector<128x128xf32> -> vector<128x128xf32>
    %149 = arith.addf %145, %148 : vector<128x128xf32>
    %c0_91 = arith.constant 0 : index
    %c0_92 = arith.constant 0 : index
    %150 = vector.load %arg7[%c0_91, %c0_92] : memref<1x128xf32, #tpu.memory_space<vmem>>, vector<1x128xf32>
    %151 = vector.broadcast %150 : vector<1x128xf32> to vector<128x128xf32>
    %152 = arith.addf %149, %151 : vector<128x128xf32>
    %cst_93 = arith.constant 0.000000e+00 : f32
    %153 = vector.broadcast %cst_93 : f32 to vector<128x128xf32>
    %154 = arith.maximumf %152, %153 : vector<128x128xf32>
    %155 = arith.truncf %154 : vector<128x128xf32> to vector<128x128xbf16>
    %c0_94 = arith.constant 0 : index
    %c0_95 = arith.constant 0 : index
    %156 = vector.load %arg8[%c0_94, %c0_95] : memref<128x128xbf16, #tpu.memory_space<vmem>>, vector<128x128xbf16>
    %cst_96 = arith.constant dense<0.000000e+00> : vector<128x128xf32>
    %157 = tpu.matmul %155, %156, %cst_96 {dimension_numbers = #tpu.dot_dimension_numbers<[1], [0], [0], [1], [0, 0, 1, 1], [], []>} : vector<128x128xbf16>, vector<128x128xbf16>, vector<128x128xf32> -> vector<128x128xf32>
    %c0_97 = arith.constant 0 : index
    %c0_98 = arith.constant 0 : index
    %158 = vector.load %arg9[%c0_97, %c0_98] : memref<1x128xf32, #tpu.memory_space<vmem>>, vector<1x128xf32>
    %159 = vector.broadcast %158 : vector<1x128xf32> to vector<128x128xf32>
    %160 = arith.addf %157, %159 : vector<128x128xf32>
    %161 = arith.extf %16 : vector<128x128xbf16> to vector<128x128xf32>
    %162 = arith.addf %160, %161 : vector<128x128xf32>
    %cst_99 = arith.constant 0.000000e+00 : f32
    %163 = vector.broadcast %cst_99 : f32 to vector<128x128xf32>
    %164 = arith.maximumf %162, %163 : vector<128x128xf32>
    %165 = vector.shape_cast %164 : vector<128x128xf32> to vector<8x16x128xf32>
    %166 = arith.truncf %165 : vector<8x16x128xf32> to vector<8x16x128xbf16>
    %c0_100 = arith.constant 0 : index
    %c0_101 = arith.constant 0 : index
    %c0_102 = arith.constant 0 : index
    %c0_103 = arith.constant 0 : index
    %167 = vector.load %arg10[%c0_100, %c0_101, %c0_102, %c0_103] : memref<1x8x16x128xbf16, #tpu.memory_space<vmem>>, vector<1x8x16x128xbf16>
    %168 = vector.shape_cast %167 : vector<1x8x16x128xbf16> to vector<8x16x128xbf16>
    %169 = vector.shape_cast %166 : vector<8x16x128xbf16> to vector<1x8x16x128xbf16>
    tpu.vector_store %arg10[%c0_100, %c0_101, %c0_102, %c0_103], %169 {strides = array<i32>} : memref<1x8x16x128xbf16, #tpu.memory_space<vmem>>, vector<1x8x16x128xbf16>,
    return
  }
  func.func @transform_0(%arg0: i32, %arg1: i32) -> (i32, i32, i32, i32) {
    %c0_i32 = arith.constant 0 : i32
    %c0_i32_0 = arith.constant 0 : i32
    %c0_i32_1 = arith.constant 0 : i32
    return %arg0, %arg1, %c0_i32, %c0_i32_0 : i32, i32, i32, i32
  }
  func.func @transform_2(%arg0: i32, %arg1: i32) -> (i32, i32) {
    %c0_i32 = arith.constant 0 : i32
    %c0_i32_0 = arith.constant 0 : i32
    %c0_i32_1 = arith.constant 0 : i32
    return %c0_i32, %c0_i32_0 : i32, i32
  }
  func.func @transform_3(%arg0: i32, %arg1: i32) -> (i32, i32) {
    %c0_i32 = arith.constant 0 : i32
    %c0_i32_0 = arith.constant 0 : i32
    %c0_i32_1 = arith.constant 0 : i32
    return %c0_i32, %c0_i32_0 : i32, i32
  }
  func.func @transform_4(%arg0: i32, %arg1: i32) -> (i32, i32) {
    %c0_i32 = arith.constant 0 : i32
    %c0_i32_0 = arith.constant 0 : i32
    %c0_i32_1 = arith.constant 0 : i32
    return %c0_i32, %c0_i32_0 : i32, i32
  }
  func.func @transform_5(%arg0: i32, %arg1: i32) -> (i32, i32) {
    %c0_i32 = arith.constant 0 : i32
    %c0_i32_0 = arith.constant 0 : i32
    %c0_i32_1 = arith.constant 0 : i32
    return %c0_i32, %c0_i32_0 : i32, i32
  }
  func.func @transform_6(%arg0: i32, %arg1: i32) -> (i32, i32) {
    %c0_i32 = arith.constant 0 : i32
    %c0_i32_0 = arith.constant 0 : i32
    %c0_i32_1 = arith.constant 0 : i32
    return %c0_i32, %c0_i32_0 : i32, i32
  }
  func.func @transform_7(%arg0: i32, %arg1: i32) -> (i32, i32) {
    %c0_i32 = arith.constant 0 : i32
    %c0_i32_0 = arith.constant 0 : i32
    %c0_i32_1 = arith.constant 0 : i32
    return %c0_i32, %c0_i32_0 : i32, i32
  }
  func.func @transform_8(%arg0: i32, %arg1: i32) -> (i32, i32, i32, i32) {
    %c0_i32 = arith.constant 0 : i32
    %c0_i32_0 = arith.constant 0 : i32
    %c0_i32_1 = arith.constant 0 : i32
    return %arg0, %arg1, %c0_i32, %c0_i32_0 : i32, i32, i32, i32
  }
}

</mosaic_0001>

<bundles_post_ra>
// kernel: bottleneck_pallas.1
= control target key start
LH: loop header
LB: loop body
LE: loop exit
PB: predicated region body
PF: predicated region fallthrough
CT: control target
= control target key end

     0   :  { %s3882_s27 = smov 0   ;;  %s3884_s28 = smov 0   ;;  %s5137_s0 = inlined_call_operand.vmem [shape: bf16[2,16,16,128], index: 0, kind: input, shape index: {}, may-alias: {0,1}]   ;;  %s5138_s1 = inlined_call_operand.vmem [shape: bf16[2,16,16,128], index: 1, kind: input, shape index: {}, may-alias: {0,1}]   ;;  %s5139_s2 = inlined_call_operand.vmem [shape: bf16[128,128], index: 2, kind: input, shape index: {}]   ;;  %s5140_s3 = inlined_call_operand.vmem [shape: f32[1,128], index: 3, kind: input, shape index: {}]   ;;  %s5141_s4 = inlined_call_operand.vmem [shape: bf16[1152,128], index: 4, kind: input, shape index: {}]   ;;  %s5142_s5 = inlined_call_operand.vmem [shape: f32[1,128], index: 5, kind: input, shape index: {}]   ;;  %s5143_s6 = inlined_call_operand.vmem [shape: bf16[128,128], index: 6, kind: input, shape index: {}]   ;;  %s5144_s7 = inlined_call_operand.vmem [shape: f32[1,128], index: 7, kind: input, shape index: {}]   ;;  %s5145_s8 = inlined_call_operand.vmem [shape: bf16[2,16,16,128], index: 8, kind: output, shape index: {}]  }
   0x1   :  { %5164 = sst [smem:[#allocation22_spill]] %s5137_s0  ;;  %s3886_s29 = smov 0  }
   0x2   :  { %s3888_s30 = smov 0   ;;  %s3890_s9 = smov 0  }
   0x3 LB: > { %s27_s10 = sadd.s32 1, %s3824_s29  ;;  %s30_s11 = sadd.s32 1, %s3828_s30  ;;  %s3832_s9 = sphi %s3890_s9, %s18_s9   ;;  %s3828_s30 = sphi %s3888_s30, %s5245_s30   ;;  %s3824_s29 = sphi %s3886_s29, %s5244_s29   ;;  %s3820_s28 = sphi %s3884_s28, %s5243_s28   ;;  %s3816_s27 = sphi %s3882_s27, %s5242_s27  }
   0x4   : > { %p28_p0 = scmp.ge.s32.totalorder %s27_s10, 2  ;;  %p2981_p1 = scmp.ge.s32.totalorder %s3832_s9, 1 }
   0x5   : > { %p260_p2 = scmp.lt.s32.totalorder %s3832_s9, 5 }
   0x6   : > { %s5247_s10 = smov (%p28_p0, %s27_s10), 0  ;;  %s5249_s11 = smov (!%p28_p0, %s30_s11), %s3828_s30 }
   0x7   : > { %5165 = sst [smem:[#allocation10_spill]] %s5247_s10  ;;  %p261_p3 = pnand %p2981_p1, %p260_p2 }
   0x8   : > { %p32_p4 = scmp.ge.s32.totalorder %s5249_s11, 2 }
   0x9   : > { %264 = sbr.rel (%p261_p3) target bundleno = 1206 (0x4b6), region = 48 }
   0xa   : > { %s5251_s11 = smov (%p32_p4, %s5249_s11), 0 }
   0xb   : > { %5166 = sst [smem:[#allocation11_spill]] %s5251_s11 }
   0xe   : > { %s2982_s12 = sshll.u32 %s3816_s27, 3  ;;  %p303_p5 = scmp.lt.s32.totalorder %s3820_s28, 1 }
   0xf   : > { %p305_p6 = scmp.lt.s32.totalorder %s2982_s12, 15  ;;  %s2991_s13 = sadd.s32 4294967295, %s2982_s12 }
  0x10   : > { %s304_s14 = scalar_select %p303_p5, %s3820_s28, 1 }
  0x11   : > { %s306_s15 = scalar_select %p305_p6, %s2982_s12, 15 }
  0x12   : > { %s2984_s16 = sshll.u32 %s304_s14, 5  ;;  %p326_p7 = scmp.gt.s32.totalorder %s2991_s13, 0 }
  0x13   : > { %s2983_s17 = sshll.u32 %s306_s15, 1  ;;  %s3573_s18 = sadd.s32 8, %s2982_s12 }
  0x14   : > { %s309_s19 = sadd.s32 %s2984_s16, %s2983_s17  ;;  %p330_p8 = scmp.lt.s32.totalorder %s3573_s18, 15 }
  0x15   : > { %s2985_s20 = sshll.u32 %s309_s19, 2  ;;  %s2994_s21 = sshll.u32 %s3820_s28, 5 }
  0x16   : > { %s5167_s0 = sld [smem:[#allocation22_spill]]  ;;  %s3928_s11 = scalar_lea.vmem %s5145_s8, %s2985_s20 }
  0x17   : > { %s5253_s13 = smov (!%p326_p7, %s2991_s13), 0  ;;  %s5255_s18 = smov (!%p330_p8, %s3573_s18), 15 }
  0x18   : > { %s2993_s14 = sshll.u32 %s5253_s13, 1 }
  0x19   : > { %s334_s10 = sadd.s32 %s2994_s21, %s2993_s14 }
  0x1a   : > { %s2995_s15 = sshll.u32 %s334_s10, 2 }
  0x1b   : > { %s336_s17 = scalar_lea.vmem %s5138_s1, %s2995_s15 }
  0x1c   : > { %s3923_s24 = scalar_lea.vmem %s5167_s0, %s2985_s20  ;;  %v363_v0 = vld [vmem:[%s336_s17] sm:$0xff] }
  0x1d   : > { %364 = vst [vmem:[#allocation3] sm:$0xff] %v363_v0 }
  0x1e   : > { %370 = vsyncadd [#allocation5], 128  ;;  %s2996_s28 = sshll.u32 %s5255_s18, 1 }
  0x1f   : > { %s372_s19 = sadd.s32 %s2996_s28, %s2994_s21 }
  0x20   : > { %s2997_s22 = sshll.u32 %s372_s19, 2 }
  0x21   : > { %s374_s20 = scalar_lea.vmem %s5138_s1, %s2997_s22 }
  0x22   : > { %v402_v1 = vld [vmem:[%s374_s20] sm:$0xff] }
  0x23   : > { %403 = vst [vmem:[#allocation4] sm:$0xff] %v402_v1 }
  0x24   : > { %409 = vsyncadd [#allocation5 + $0x1], 128  ;;  %v3937_v2 = vld [vmem:[%s3923_s24] sm:$0xff]   ;;  %v3940_v3 = vld [vmem:[%s3923_s24 + $0x8] sm:$0xff]  }
  0x25   : > { %5168 = vst [vmem:[#allocation12_spill] sm:$0xff] %v3937_v2  ;;  %v3943_v4 = vld [vmem:[%s3923_s24 + $0x10] sm:$0xff]   ;;  %v3946_v5 = vld [vmem:[%s3923_s24 + $0x18] sm:$0xff]   ;;  %v3949_v6 = vld [vmem:[%s3923_s24 + $0x20] sm:$0xff]  }
  0x26   : > { %5169 = vst [vmem:[#allocation13_spill] sm:$0xff] %v3940_v3  ;;  %v3952_v7 = vld [vmem:[%s3923_s24 + $0x28] sm:$0xff]   ;;  %v3955_v8 = vld [vmem:[%s3923_s24 + $0x30] sm:$0xff]   ;;  %v3958_v9 = vld [vmem:[%s3923_s24 + $0x38] sm:$0xff]  }
  0x27   : > { %5170 = vst [vmem:[#allocation14_spill] sm:$0xff] %v3943_v4  ;;  %v3589_v10 = vld [vmem:[%s5139_s2 + $0x38] sm:$0xff]  ;;  %v3588_v11 = vld [vmem:[%s5139_s2 + $0x30] sm:$0xff]  ;;  %v3587_v12 = vld [vmem:[%s5139_s2 + $0x28] sm:$0xff] }
  0x28   : > { %5171 = vst [vmem:[#allocation15_spill] sm:$0xff] %v3946_v5  ;;  %542 = vmatpush.bf16.msra.mxu0 %v3589_v10  ;;  %v3586_v13 = vld [vmem:[%s5139_s2 + $0x20] sm:$0xff]  ;;  %v3585_v14 = vld [vmem:[%s5139_s2 + $0x18] sm:$0xff]  ;;  %v3584_v15 = vld [vmem:[%s5139_s2 + $0x10] sm:$0xff] }
  0x29   : > { %5172 = vst [vmem:[#allocation16_spill] sm:$0xff] %v3949_v6  ;;  %v3583_v16 = vld [vmem:[%s5139_s2 + $0x8] sm:$0xff]  ;;  %v3582_v17 = vld [vmem:[%s5139_s2] sm:$0xff]  ;;  %v3576_v20 = vld [vmem:[%s3923_s24 + $0x10] sm:$0xff] }
  0x2a   : > { %5173 = vst [vmem:[#allocation17_spill] sm:$0xff] %v3952_v7  ;;  %v3574_v18 = vld [vmem:[%s3923_s24] sm:$0xff]  ;;  %v3575_v19 = vld [vmem:[%s3923_s24 + $0x8] sm:$0xff]  ;;  %v3577_v21 = vld [vmem:[%s3923_s24 + $0x18] sm:$0xff] }
  0x2b   : > { %5174 = vst [vmem:[#allocation18_spill] sm:$0xff] %v3955_v8  ;;  %v3578_v22 = vld [vmem:[%s3923_s24 + $0x20] sm:$0xff]  ;;  %v3579_v23 = vld [vmem:[%s3923_s24 + $0x28] sm:$0xff]  ;;  %v3580_v24 = vld [vmem:[%s3923_s24 + $0x30] sm:$0xff] }
  0x2c   : > { %5175 = vst [vmem:[#allocation19_spill] sm:$0xff] %v3958_v9  ;;  %543 = vmatpush.bf16.msra.mxu0 %v3588_v11  ;;  %v3581_v25 = vld [vmem:[%s3923_s24 + $0x38] sm:$0xff]  ;;  %v3786_v26 = vld [vmem:[%s5140_s3] ss:$0 sm:$0xff] }
  0x30   : > { %544 = vmatpush.bf16.msra.mxu0 %v3587_v12 }
  0x34   : > { %545 = vmatpush.bf16.msra.mxu0 %v3586_v13 }
  0x38   : > { %546 = vmatpush.bf16.msra.mxu0 %v3585_v14 }
  0x3c   : > { %547 = vmatpush.bf16.msra.mxu0 %v3584_v15 }
  0x40   : > { %548 = vmatpush.bf16.msra.mxu0 %v3583_v16 }
  0x44   : > { %549 = vmatpush.bf16.msra.mxu0 %v3582_v17 }
  0x47   : > { %550 = vmatmul.bf16.vlgmr.msra.gmra.mxu0 %v3574_v18 }
  0x57   : > { %555 = vmatmul.bf16.gmra.mxu0 %v3575_v19 }
  0x67   : > { %560 = vmatmul.bf16.gmra.mxu0 %v3576_v20 }
  0x77   : > { %565 = vmatmul.bf16.gmra.mxu0 %v3577_v21 }
  0x87   : > { %570 = vmatmul.bf16.gmra.mxu0 %v3578_v22 }
  0x97   : > { %575 = vmatmul.bf16.gmra.mxu0 %v3579_v23 }
  0xa7   : > { %580 = vmatmul.bf16.gmra.mxu0 %v3580_v24 }
  0xb7   : > { %585 = vmatmul.bf16.gmra.mxu0 %v3581_v25 }
  0xc4   : > { %v551_v27 = vpop.f32.mrf.mxu0 }
  0xc5   : > { %v552_v28 = vadd.f32 %v3786_v26, %v551_v27 }
  0xc7   : > { %v591_v29 = vmax.f32 %v552_v28, 0.0 }
  0xc9   : > { %607 = vst [vmem:[#allocation2 + $0x10] sm:$0xff] %v591_v29 }
  0xcc   : > { %v553_v30 = vpop.f32.mrf.mxu0 }
  0xcd   : > { %v554_v31 = vadd.f32 %v3786_v26, %v553_v30 }
  0xcf   : > { %v592_v32 = vmax.f32 %v554_v31, 0.0 }
  0xd1   : > { %608 = vst [vmem:[#allocation2 + $0x48] sm:$0xff] %v592_v32 }
  0xd4   : > { %v556_v33 = vpop.f32.mrf.mxu0 }
  0xd5   : > { %v557_v34 = vadd.f32 %v3786_v26, %v556_v33 }
  0xd7   : > { %v593_v35 = vmax.f32 %v557_v34, 0.0 }
  0xd9   : > { %609 = vst [vmem:[#allocation2 + $0x60] sm:$0xff] %v593_v35 }
  0xdc   : > { %v558_v36 = vpop.f32.mrf.mxu0 }
  0xdd   : > { %v559_v37 = vadd.f32 %v3786_v26, %v558_v36 }
  0xdf   : > { %v594_v38 = vmax.f32 %v559_v37, 0.0 }
  0xe1   : > { %610 = vst [vmem:[#allocation2 + $0x28] sm:$0xff] %v594_v38 }
  0xe4   : > { %v561_v39 = vpop.f32.mrf.mxu0 }
  0xe5   : > { %v562_v40 = vadd.f32 %v3786_v26, %v561_v39 }
  0xe7   : > { %v595_v41 = vmax.f32 %v562_v40, 0.0 }
  0xe9   : > { %611 = vst [vmem:[#allocation2 + $0x40] sm:$0xff] %v595_v41 }
  0xec   : > { %v563_v42 = vpop.f32.mrf.mxu0 }
  0xed   : > { %v564_v43 = vadd.f32 %v3786_v26, %v563_v42 }
  0xef   : > { %v596_v44 = vmax.f32 %v564_v43, 0.0 }
  0xf1   : > { %612 = vst [vmem:[#allocation2 + $0x78] sm:$0xff] %v596_v44 }
  0xf4   : > { %v566_v45 = vpop.f32.mrf.mxu0 }
  0xf5   : > { %v567_v46 = vadd.f32 %v3786_v26, %v566_v45 }
  0xf7   : > { %v597_v47 = vmax.f32 %v567_v46, 0.0 }
  0xf9   : > { %613 = vst [vmem:[#allocation2 + $0x88] sm:$0xff] %v597_v47 }
  0xfc   : > { %v568_v48 = vpop.f32.mrf.mxu0 }
  0xfd   : > { %v569_v49 = vadd.f32 %v3786_v26, %v568_v48 }
  0xff   : > { %v598_v50 = vmax.f32 %v569_v49, 0.0 }
 0x101   : > { %614 = vst [vmem:[#allocation2] sm:$0xff] %v598_v50 }
 0x104   : > { %v571_v51 = vpop.f32.mrf.mxu0 }
 0x105   : > { %v572_v52 = vadd.f32 %v3786_v26, %v571_v51 }
 0x107   : > { %v599_v53 = vmax.f32 %v572_v52, 0.0 }
 0x109   : > { %615 = vst [vmem:[#allocation2 + $0x18] sm:$0xff] %v599_v53 }
 0x10c   : > { %v573_v54 = vpop.f32.mrf.mxu0 }
 0x10d   : > { %v574_v55 = vadd.f32 %v3786_v26, %v573_v54 }
 0x10f   : > { %v600_v56 = vmax.f32 %v574_v55, 0.0 }
 0x111   : > { %616 = vst [vmem:[#allocation2 + $0x8] sm:$0xff] %v600_v56 }
 0x114   : > { %v576_v57 = vpop.f32.mrf.mxu0 }
 0x115   : > { %v577_v58 = vadd.f32 %v3786_v26, %v576_v57 }
 0x117   : > { %v601_v59 = vmax.f32 %v577_v58, 0.0 }
 0x119   : > { %617 = vst [vmem:[#allocation2 + $0x38] sm:$0xff] %v601_v59 }
 0x11c   : > { %v578_v60 = vpop.f32.mrf.mxu0 }
 0x11d   : > { %v579_v61 = vadd.f32 %v3786_v26, %v578_v60 }
 0x11f   : > { %v602_v62 = vmax.f32 %v579_v61, 0.0 }
 0x121   : > { %618 = vst [vmem:[#allocation2 + $0x50] sm:$0xff] %v602_v62 }
 0x124   : > { %v581_v63 = vpop.f32.mrf.mxu0 }
 0x125   : > { %v582_v0 = vadd.f32 %v3786_v26, %v581_v63 }
 0x127   : > { %v603_v1 = vmax.f32 %v582_v0, 0.0 }
 0x129   : > { %619 = vst [vmem:[#allocation2 + $0x68] sm:$0xff] %v603_v1 }
 0x12c   : > { %v583_v10 = vpop.f32.mrf.mxu0 }
 0x12d   : > { %v584_v11 = vadd.f32 %v3786_v26, %v583_v10 }
 0x12f   : > { %v604_v12 = vmax.f32 %v584_v11, 0.0 }
 0x131   : > { %620 = vst [vmem:[#allocation2 + $0x20] sm:$0xff] %v604_v12 }
 0x134   : > { %v586_v13 = vpop.f32.mrf.mxu0 }
 0x135   : > { %v587_v14 = vadd.f32 %v3786_v26, %v586_v13 }
 0x137   : > { %v605_v15 = vmax.f32 %v587_v14, 0.0 }
 0x139   : > { %621 = vst [vmem:[#allocation2 + $0x98] sm:$0xff] %v605_v15 }
 0x13c   : > { %v588_v16 = vpop.f32.mrf.mxu0 }
 0x13d   : > { %v589_v17 = vadd.f32 %v3786_v26, %v588_v16 }
 0x13f   : > { %v606_v18 = vmax.f32 %v589_v17, 0.0 }
 0x141   : > { %622 = vst [vmem:[#allocation2 + $0x70] sm:$0xff] %v606_v18 }
 0x142   : > { %3810 = dma.done.wait [#allocation5], 128 }
 0x143   : > { %3811 = vsyncadd [#allocation5], 4294967168 }
 0x144   : > { %3812 = dma.done.wait [#allocation5 + $0x1], 128 }
 0x145   : > { %3813 = vsyncadd [#allocation5 + $0x1], 4294967168  ;;  %v3599_v19 = vld [vmem:[%s5139_s2 + $0x38] sm:$0xff]  ;;  %v3598_v20 = vld [vmem:[%s5139_s2 + $0x30] sm:$0xff]  ;;  %p3102_p9 = scmp.ne.s32.totalorder %s3816_s27, 0 }
 0x146   : > { %708 = vmatpush.bf16.msra.mxu1 %v3599_v19  ;;  %730 = vmatpush.bf16.msra.mxu2 %v3599_v19  ;;  %v3597_v21 = vld [vmem:[%s5139_s2 + $0x28] sm:$0xff]  ;;  %v3596_v22 = vld [vmem:[%s5139_s2 + $0x20] sm:$0xff]  ;;  %v3595_v23 = vld [vmem:[%s5139_s2 + $0x18] sm:$0xff] }
 0x147   : > { %v3594_v24 = vld [vmem:[%s5139_s2 + $0x10] sm:$0xff]  ;;  %v3593_v25 = vld [vmem:[%s5139_s2 + $0x8] sm:$0xff]  ;;  %v3592_v26 = vld [vmem:[%s5139_s2] sm:$0xff] }
 0x148   : > { %v3590_v27 = vld [vmem:[#allocation3] sm:$0xff]  ;;  %v3591_v28 = vld [vmem:[#allocation4] sm:$0xff] }
 0x149   : > { %v3787_v29 = vld [vmem:[%s5140_s3] ss:$0 sm:$0xff] }
 0x14a   : > { %709 = vmatpush.bf16.msra.mxu1 %v3598_v20  ;;  %731 = vmatpush.bf16.msra.mxu2 %v3598_v20 }
 0x14e   : > { %710 = vmatpush.bf16.msra.mxu1 %v3597_v21  ;;  %732 = vmatpush.bf16.msra.mxu2 %v3597_v21 }
 0x152   : > { %711 = vmatpush.bf16.msra.mxu1 %v3596_v22  ;;  %733 = vmatpush.bf16.msra.mxu2 %v3596_v22 }
 0x156   : > { %712 = vmatpush.bf16.msra.mxu1 %v3595_v23  ;;  %734 = vmatpush.bf16.msra.mxu2 %v3595_v23 }
 0x15a   : > { %713 = vmatpush.bf16.msra.mxu1 %v3594_v24  ;;  %735 = vmatpush.bf16.msra.mxu2 %v3594_v24 }
 0x15e   : > { %714 = vmatpush.bf16.msra.mxu1 %v3593_v25  ;;  %736 = vmatpush.bf16.msra.mxu2 %v3593_v25 }
 0x162   : > { %715 = vmatpush.bf16.msra.mxu1 %v3592_v26  ;;  %737 = vmatpush.bf16.msra.mxu2 %v3592_v26 }
 0x165   : > { %716 = vmatmul.bf16.vlgmr.msra.gmra.mxu1 %v3590_v27  ;;  %738 = vmatmul.bf16.vlgmr.msra.gmra.mxu2 %v3591_v28 }
 0x1e2   : > { %v717_v30 = vpop.f32.mrf.mxu1 }
 0x1e3   : > { %v718_v31 = vadd.f32 %v3787_v29, %v717_v30 }
 0x1e5   : > { %v722_v32 = vmax.f32 %v718_v31, 0.0 }
 0x1e7   : > { %746 = vst [vmem:[#allocation2 + $0x30] sm:$0xff] %v722_v32 }
 0x1e8   : > { %v739_v33 = vpop.f32.mrf.mxu2 }
 0x1e9   : > { %v740_v34 = vadd.f32 %v3787_v29, %v739_v33 }
 0x1ea   : > { %v719_v35 = vpop.f32.mrf.mxu1 }
 0x1eb   : > { %v744_v36 = vmax.f32 %v740_v34, 0.0  ;;  %v720_v37 = vadd.f32 %v3787_v29, %v719_v35 }
 0x1ed   : > { %748 = vst [vmem:[#allocation2 + $0x80] sm:$0xff] %v744_v36  ;;  %v723_v38 = vmax.f32 %v720_v37, 0.0 }
 0x1ef   : > { %747 = vst [vmem:[#allocation2 + $0x58] sm:$0xff] %v723_v38 }
 0x1f0   : > { %v741_v39 = vpop.f32.mrf.mxu2 }
 0x1f1   : > { %v742_v40 = vadd.f32 %v3787_v29, %v741_v39  ;;  %753 = sbr.rel (%p3102_p9) target bundleno = 505 (0x1f9), region = 120 }
 0x1f3   : > { %v745_v41 = vmax.f32 %v742_v40, 0.0 }
 0x1f5   : > { %749 = vst [vmem:[#allocation2 + $0x90] sm:$0xff] %v745_v41 }
 0x1f6   : > { %v3834_v42 = vmov 0.0  }
 0x1f7   : > { %754 = vst [vmem:[#allocation2 + $0x30] sm:$0xff] %v3834_v42 }
 0x1f8   : > { %755 = vst [vmem:[#allocation2 + $0x58] sm:$0xff] %v3834_v42 }
 0x1f9 PF: > { %p3103_p10 = scmp.ne.s32.totalorder %s3816_s27, 1 }
 0x1fb   : > { %759 = sbr.rel (%p3103_p10) target bundleno = 515 (0x203), region = 124 }
 0x200   : > { %v3835_v43 = vmov 0.0  }
 0x201   : > { %760 = vst [vmem:[#allocation2 + $0x80] sm:$0xff] %v3835_v43 }
 0x202   : > { %761 = vst [vmem:[#allocation2 + $0x90] sm:$0xff] %v3835_v43 }
 0x203 PF: > { %v3615_v44 = vld [vmem:[%s5141_s4 + $0x78] sm:$0xff]  ;;  %v3614_v46 = vld [vmem:[%s5141_s4 + $0x70] sm:$0xff]  ;;  %v3613_v48 = vld [vmem:[%s5141_s4 + $0x68] sm:$0xff]  ;;  %v762_v52 = vlaneseq  ;;  %vm5150_vm3 = vmmov 1  }
 0x204   : > { %v3607_v45 = vld [vmem:[%s5141_s4 + $0x38] sm:$0xff]  ;;  %1277 = vmatpush.bf16.msra.mxu3 %v3615_v44  ;;  %v3606_v47 = vld [vmem:[%s5141_s4 + $0x30] sm:$0xff]  ;;  %v3605_v49 = vld [vmem:[%s5141_s4 + $0x28] sm:$0xff] }
 0x205   : > { %3727 = vmatpush.bf16.msrb.mxu2 %v3607_v45  ;;  %1374 = vmatpush.bf16.msrb.mxu1 %v3607_v45  ;;  %v3612_v50 = vld [vmem:[%s5141_s4 + $0x60] sm:$0xff]  ;;  %v3611_v53 = vld [vmem:[%s5141_s4 + $0x58] sm:$0xff]  ;;  %v4054_v55 = vshrl.u32 %v762_v52, 7  ;;  %v3610_v56 = vld [vmem:[%s5141_s4 + $0x50] sm:$0xff] }
 0x206   : > { %v3604_v51 = vld [vmem:[%s5141_s4 + $0x20] sm:$0xff]  ;;  %v3603_v54 = vld [vmem:[%s5141_s4 + $0x18] sm:$0xff]  ;;  %v3602_v57 = vld [vmem:[%s5141_s4 + $0x10] sm:$0xff] }
 0x207   : > { %v3631_v58 = vld [vmem:[%s5141_s4 + $0xf8] sm:$0xff]  ;;  %v773_v59 = vadd.s32 80, %v4054_v55  ;;  %v4066_v60 = vld [vmem:[#allocation2] sm:$0xff]  ;;  %v4070_v62 = vld [vmem:[#allocation2 + $0x8] sm:$0xff]  ;;  %vm5146_vm0 = vcmp.lt.s32.totalorder %v4054_v55, 1  ;;  %v783_v20 = vand.u32 15, %v4054_v55 }
 0x208   : > { %1278 = vmatpush.bf16.msra.mxu3 %v3614_v46  ;;  %v4068_v61 = vld [vmem:[#allocation2 + $0x18] sm:$0xff]  ;;  %v4072_v63 = vld [vmem:[#allocation2 + $0x20] sm:$0xff]  ;;  %1744 = vmatpush.bf16.msrb.mxu0 %v3631_v58  ;;  %v3630_v0 = vld [vmem:[%s5141_s4 + $0xf0] sm:$0xff]  ;;  %v1028_v13 = vrot.slane %v4066_v60, 7  ;;  %v1030_v15 = vrot.slane %v4070_v62, 7  ;;  %v775_v38 = vadd.s32 96, %v4054_v55 }
 0x209   : > { %3728 = vmatpush.bf16.msrb.mxu2 %v3606_v47  ;;  %1375 = vmatpush.bf16.msrb.mxu1 %v3606_v47  ;;  %v3609_v1 = vld [vmem:[%s5141_s4 + $0x48] sm:$0xff]  ;;  %v4083_v11 = vld [vmem:[#allocation2 + $0x30] sm:$0xff]  ;;  %v4085_v12 = vld [vmem:[#allocation2 + $0x58] sm:$0xff]  ;;  %v1029_v14 = vrot.slane %v4068_v61, 7  ;;  %v853_v18 = vand.u32 15, %v773_v59  ;;  %v4094_v19 = vrot.slane %v4072_v63, 7 }
 0x20a   : > { %v3601_v10 = vld [vmem:[%s5141_s4 + $0x8] sm:$0xff]  ;;  %v1019_v16 = vrot.slane %v4083_v11, 7  ;;  %v1020_v17 = vrot.slane %v4085_v12, 7  ;;  %v3608_v21 = vld [vmem:[%s5141_s4 + $0x40] sm:$0xff]  ;;  %v3639_v25 = vld [vmem:[%s5141_s4 + $0x138] sm:$0xff]  ;;  %vm971_vm2 = vcmp.ge.s32.totalorder %v783_v20, 1  ;;  %v1205_v29 = vpack.c.bf16 %v4085_v12, %v4083_v11 }
 0x20b   : > { %v3600_v22 = vld [vmem:[%s5141_s4] sm:$0xff]  ;;  %v1040_v23 = vsel %vm5146_vm0, %v1029_v14, %v1030_v15  ;;  %v1041_v24 = vsel %vm5146_vm0, %v1028_v13, %v1029_v14  ;;  %vm981_vm1 = vcmp.ge.s32.totalorder %v853_v18, 1  ;;  %v3623_v28 = vld [vmem:[%s5141_s4 + $0xb8] sm:$0xff]  ;;  %vm4134_vm5 = vmpackc.low %vm5150_vm3, %vm971_vm2  ;;  %v765_v42 = vadd.s32 16, %v4054_v55 }
 0x20c   : > { %1279 = vmatpush.bf16.msra.mxu3 %v3613_v48  ;;  %1745 = vmatpush.bf16.msrb.mxu0 %v3630_v0  ;;  %v1050_v26 = vsel %vm5146_vm0, %v1019_v16, %v1020_v17  ;;  %v1051_v27 = vsel %vm5146_vm0, %v4094_v19, %v1019_v16  ;;  %v4126_v30 = vpack.c.bf16 %v1040_v23, %v1041_v24  ;;  %vm4129_vm4 = vmpackc.low %vm5150_vm3, %vm981_vm1  ;;  %v3638_v34 = vld [vmem:[%s5141_s4 + $0x130] sm:$0xff]  ;;  %v3629_v36 = vld [vmem:[%s5141_s4 + $0xe8] sm:$0xff]  ;;  %v777_v23 = vadd.s32 112, %v4054_v55 }
 0x20d   : > { %3729 = vmatpush.bf16.msrb.mxu2 %v3605_v49  ;;  %1376 = vmatpush.bf16.msrb.mxu1 %v3605_v49  ;;  %v3169_v32 = vpack.c.bf16 %v1050_v26, %v1051_v27  ;;  %v3622_v35 = vld [vmem:[%s5141_s4 + $0xb0] sm:$0xff]  ;;  %v3628_v37 = vld [vmem:[%s5141_s4 + $0xe0] sm:$0xff]  ;;  %v4156_v39 = vld [vmem:[#allocation2 + $0x38] sm:$0xff]  ;;  %v797_v52 = vand.u32 15, %v765_v42  ;;  %v767_v26 = vadd.s32 32, %v4054_v55  ;;  %vm1116_vm14 = vcmp.lt.s32.totalorder %v4054_v55, 7 }
 0x20e   : > { %v4158_v40 = vld [vmem:[#allocation2 + $0x50] sm:$0xff]  ;;  %v3637_v41 = vld [vmem:[%s5141_s4 + $0x128] sm:$0xff]  ;;  %v1031_v46 = vrot.slane %v4156_v39, 7  ;;  %v3627_v48 = vld [vmem:[%s5141_s4 + $0xd8] sm:$0xff]  ;;  %v4657_v5 = vrot.slane %v4072_v63, 1 }
 0x20f   : > { %v3621_v43 = vld [vmem:[%s5141_s4 + $0xa8] sm:$0xff]  ;;  %v4167_v44 = vld [vmem:[#allocation2 + $0x10] sm:$0xff]  ;;  %v1032_v47 = vrot.slane %v4158_v40, 7  ;;  %vm973_vm7 = vcmp.ge.s32.totalorder %v797_v52, 1  ;;  %v3619_v0 = vld [vmem:[%s5141_s4 + $0x98] sm:$0xff] }
 0x210   : > { %1280 = vmatpush.bf16.msra.mxu3 %v3612_v50  ;;  %1746 = vmatpush.bf16.msrb.mxu0 %v3629_v36  ;;  %v4169_v45 = vld [vmem:[#allocation2 + $0x48] sm:$0xff]  ;;  %v1021_v49 = vrot.slane %v4167_v44, 7  ;;  %vm4211_vm9 = vmpackc.low %vm5150_vm3, %vm973_vm7  ;;  %v3636_v20 = vld [vmem:[%s5141_s4 + $0x120] sm:$0xff] }
 0x211   : > { %3730 = vmatpush.bf16.msrb.mxu2 %v3604_v51  ;;  %1377 = vmatpush.bf16.msrb.mxu1 %v3604_v51  ;;  %v1022_v50 = vrot.slane %v4169_v45, 7  ;;  %v867_v51 = vand.u32 15, %v775_v38  ;;  %v3625_v18 = vld [vmem:[%s5141_s4 + $0xc8] sm:$0xff]  ;;  %v881_v38 = vand.u32 15, %v777_v23  ;;  %v3616_v42 = vld [vmem:[%s5141_s4 + $0x80] sm:$0xff] }
 0x212   : > { %v1049_v59 = vsel %vm5146_vm0, %v1020_v17, %v1021_v49  ;;  %v3618_v17 = vld [vmem:[%s5141_s4 + $0x90] sm:$0xff]  ;;  %v4236_v24 = vld [vmem:[#allocation2 + $0x68] sm:$0xff] }
 0x213   : > { %vm983_vm6 = vcmp.ge.s32.totalorder %v867_v51, 1  ;;  %v1048_v58 = vsel %vm5146_vm0, %v1021_v49, %v1022_v50  ;;  %v3617_v27 = vld [vmem:[%s5141_s4 + $0x88] sm:$0xff]  ;;  %vm985_vm10 = vcmp.ge.s32.totalorder %v881_v38, 1 }
 0x214   : > { %1281 = vmatpush.bf16.msra.mxu3 %v3611_v53  ;;  %1747 = vmatpush.bf16.msrb.mxu0 %v3628_v37  ;;  %v3620_v53 = vld [vmem:[%s5141_s4 + $0xa0] sm:$0xff]  ;;  %vm4206_vm8 = vmpackc.low %vm5150_vm3, %vm983_vm6  ;;  %v4756_v16 = vld [vmem:[#allocation2 + $0x8] sm:$0xff] }
 0x215   : > { %3731 = vmatpush.bf16.msrb.mxu2 %v3603_v54  ;;  %1378 = vmatpush.bf16.msrb.mxu1 %v3603_v54  ;;  %v1038_v54 = vsel %vm5146_vm0, %v1031_v46, %v1032_v47  ;;  %vm4277_vm12 = vmpackc.low %vm5150_vm3, %vm985_vm10  ;;  %v3677_v14 = vld [vmem:[%s5143_s6 + $0x28] sm:$0xff] }
 0x218   : > { %1282 = vmatpush.bf16.msra.mxu3 %v3610_v56  ;;  %v1039_v56 = vsel %vm5146_vm0, %v1030_v15, %v1031_v46  ;;  %1748 = vmatpush.bf16.msrb.mxu0 %v3627_v48  ;;  %v3172_v15 = vpack.c.bf16 %v1048_v58, %v1049_v59  ;;  %v1101_v59 = vrot.slane %v4085_v12, 1 }
 0x219   : > { %3732 = vmatpush.bf16.msrb.mxu2 %v3602_v57  ;;  %1379 = vmatpush.bf16.msrb.mxu1 %v3602_v57  ;;  %v3626_v57 = vld [vmem:[%s5141_s4 + $0xd0] sm:$0xff] }
 0x21c   : > { %1283 = vmatpush.bf16.msra.mxu3 %v3609_v1  ;;  %v4201_v1 = vpack.c.bf16 %v4169_v45, %v4167_v44  ;;  %1749 = vmatpush.bf16.msrb.mxu0 %v3626_v57  ;;  %v769_v57 = vadd.s32 48, %v4054_v55 }
 0x21d   : > { %3733 = vmatpush.bf16.msrb.mxu2 %v3601_v10  ;;  %1380 = vmatpush.bf16.msrb.mxu1 %v3601_v10  ;;  %v4203_v10 = vpack.c.bf16 %v1038_v54, %v1039_v56  ;;  %v764_v56 = vadd.s32 8, %v4054_v55  ;;  %v4793_v54 = vld [vmem:[#allocation2 + $0x50] sm:$0xff] }
 0x21e   : > { %v825_v23 = vand.u32 15, %v769_v57 }
 0x220   : > { %1284 = vmatpush.bf16.msra.mxu3 %v3608_v21  ;;  %1750 = vmatpush.bf16.msrb.mxu0 %v3625_v18  ;;  %v3624_v21 = vld [vmem:[%s5141_s4 + $0xc0] sm:$0xff]  ;;  %vm977_vm1 = vcmp.ge.s32.totalorder %v825_v23, 1 }
 0x221   : > { %3734 = vmatpush.bf16.msrb.mxu2 %v3600_v22  ;;  %1381 = vmatpush.bf16.msrb.mxu1 %v3600_v22  ;;  %v4233_v22 = vld [vmem:[#allocation2 + $0x70] sm:$0xff]  ;;  %vm4335_vm6 = vmpackc.low %vm5150_vm3, %vm977_vm1 }
 0x223   : > { %1285 = vmatmul.bf16.vlgmr.msra.gmra.mxu3 %v1205_v29  ;;  %v1007_v29 = vld [vmem:[#allocation2 + $0x60] sm:$0xff] }
 0x224   : > { %1881 = vmatpush.bf16.msrb.mxu3 %v3639_v25  ;;  %3185 = vmatmul.msk.bf16.vlgmr.msrb.gmra.mxu2 %vm4129_vm4, %v4126_v30  ;;  %v1591_v25 = vrot.slane %v4233_v22, 7  ;;  %v4250_v36 = vrot.slane %v1007_v29, 7 }
 0x225   : > { %1495 = vmatpush.bf16.msra.mxu2 %v3623_v28  ;;  %3170 = vmatmul.msk.bf16.vlgmr.msrb.gmra.mxu1 %vm4134_vm5, %v3169_v32  ;;  %v4247_v32 = vld [vmem:[#allocation2 + $0x28] sm:$0xff] }
 0x226   : > { %v1607_v28 = vsel %vm5146_vm0, %v1591_v25, %v1021_v49  ;;  %1751 = vmatpush.bf16.msrb.mxu0 %v3624_v21  ;;  %v1024_v37 = vrot.slane %v4247_v32, 7  ;;  %v1047_v49 = vsel %vm5146_vm0, %v1022_v50, %v4250_v36  ;;  %v4272_v51 = vpack.c.bf16 %v4247_v32, %v1007_v29  ;;  %v3635_v50 = vld [vmem:[%s5141_s4 + $0x118] sm:$0xff] }
 0x227   : > { %v790_v21 = vand.u32 15, %v764_v56 }
 0x228   : > { %1882 = vmatpush.bf16.msrb.mxu3 %v3638_v34  ;;  %v1033_v34 = vrot.slane %v4236_v24, 7  ;;  %v4266_v48 = vsel %vm5146_vm0, %v4250_v36, %v1024_v37 }
 0x229   : > { %1496 = vmatpush.bf16.msra.mxu2 %v3622_v35  ;;  %v3281_v35 = vpack.c.bf16 %v1048_v58, %v1607_v28  ;;  %v5148_v58 = vrot.slane %v4083_v11, 1  ;;  %vm988_vm15 = vcmp.lt.s32.totalorder %v790_v21, 15 }
 0x22a   : > { %v1037_v46 = vsel %vm5146_vm0, %v1032_v47, %v1033_v34  ;;  %vm4328_vm2 = vmpackc.low %vm988_vm15, %vm5150_vm3 }
 0x22b   : > { %3282 = vmatmul.msk.bf16.vlgmr.msrb.gmra.mxu0 %vm4134_vm5, %v3281_v35  ;;  %v5188_v35 = vmov 0 }
 0x22c   : > { %1883 = vmatpush.bf16.msrb.mxu3 %v3637_v41  ;;  %v811_v41 = vand.u32 15, %v767_v26  ;;  %v5189_v35 = vsel %vm4328_vm2, 4294967295, %v5188_v35 }
 0x22d   : > { %1497 = vmatpush.bf16.msra.mxu2 %v3621_v43  ;;  %v1036_v43 = vsel %vm5146_vm0, %v1033_v34, %v4094_v19 }
 0x22e   : > { %vm975_vm11 = vcmp.ge.s32.totalorder %v811_v41, 1  ;;  %v4274_v52 = vpack.c.bf16 %v1036_v43, %v1037_v46  ;;  %v771_v43 = vadd.s32 64, %v4054_v55  ;;  %v1103_v46 = vrot.slane %v4169_v45, 1 }
 0x22f   : > { %vm4283_vm13 = vmpackc.low %vm5150_vm3, %vm975_vm11 }
 0x230   : > { %1884 = vmatpush.bf16.msrb.mxu3 %v3636_v20  ;;  %v839_v57 = vand.u32 15, %v771_v43 }
 0x231   : > { %1498 = vmatpush.bf16.msra.mxu2 %v3620_v53  ;;  %v3175_v53 = vpack.c.bf16 %v4266_v48, %v1047_v49  ;;  %v4351_v49 = vrot.slane %v1007_v29, 1 }
 0x232   : > { %vm979_vm10 = vcmp.ge.s32.totalorder %v839_v57, 1 }
 0x233   : > { %1290 = vmatmul.bf16.gmra.mxu3 %v4201_v1  ;;  %5192 = vst [vmem:[#allocation20_spill] sm:$0xff] %v4351_v49  ;;  %vm4390_vm15 = vmpackc.low %vm5150_vm3, %vm979_vm10 }
 0x234   : > { %3188 = vmatmul.msk.bf16.gmra.mxu2 %vm4206_vm8, %v4203_v10  ;;  %1885 = vmatpush.bf16.msrb.mxu3 %v3635_v50 }
 0x235   : > { %1499 = vmatpush.bf16.msra.mxu2 %v3619_v0  ;;  %3173 = vmatmul.msk.bf16.gmra.mxu1 %vm4211_vm9, %v3172_v15  ;;  %v4301_v0 = vrot.slane %v4167_v44, 1  ;;  %v4303_v15 = vld [vmem:[#allocation2 + $0x40] sm:$0xff]  ;;  %v1131_v44 = vsel %vm1116_vm14, %v5148_v58, %v1101_v59  ;;  %v1114_v58 = vrot.slane %v4236_v24, 1 }
 0x236   : > { %v1025_v18 = vrot.slane %v4303_v15, 7  ;;  %v1106_v43 = vrot.slane %v4303_v15, 1 }
 0x237   : > { %v1130_v12 = vsel %vm1116_vm14, %v1101_v59, %v4301_v0  ;;  %v1128_v59 = vsel %vm1116_vm14, %v1103_v46, %v4351_v49  ;;  %v1129_v45 = vsel %vm1116_vm14, %v4301_v0, %v1103_v46 }
 0x238   : > { %v3225_v34 = vpack.c.bf16 %v1130_v12, %v1131_v44  ;;  %v4381_v23 = vpack.c.bf16 %v1128_v59, %v1129_v45  ;;  %v4424_v59 = vpack.c.bf16 %v4070_v62, %v4068_v61  ;;  %v3645_v45 = vld [vmem:[%s5141_s4 + $0x168] sm:$0xff] }
 0x239   : > { %1500 = vmatpush.bf16.msra.mxu2 %v3618_v17  ;;  %v4305_v17 = vld [vmem:[#allocation2 + $0x78] sm:$0xff] }
 0x23a   : > { %v1026_v20 = vrot.slane %v4305_v17, 7  ;;  %v4325_v28 = vpack.c.bf16 %v4305_v17, %v4303_v15  ;;  %v5197_v15 = vmov 0 }
 0x23b   : > { %3285 = vmatmul.msk.bf16.gmra.mxu0 %vm4211_vm9, %v3175_v53 }
 0x23c   : > { %v1044_v26 = vsel %vm5146_vm0, %v1025_v18, %v1026_v20 }
 0x23d   : > { %1501 = vmatpush.bf16.msra.mxu2 %v3617_v27  ;;  %v1045_v27 = vsel %vm5146_vm0, %v1024_v37, %v1025_v18  ;;  %v3634_v37 = vld [vmem:[%s5141_s4 + $0x110] sm:$0xff] }
 0x23e   : > { %v4332_v38 = vpack.c.bf16 %v1044_v26, %v1045_v27  ;;  %1886 = vmatpush.bf16.msrb.mxu3 %v3634_v37  ;;  %v3647_v26 = vld [vmem:[%s5141_s4 + $0x178] sm:$0xff]  ;;  %v3646_v37 = vld [vmem:[%s5141_s4 + $0x170] sm:$0xff] }
 0x23f   : > { %v3655_v27 = vld [vmem:[%s5141_s4 + $0x1b8] sm:$0xff]  ;;  %2018 = vmatpush.bf16.msra.mxu1 %v3647_v26  ;;  %v770_v26 = vadd.s32 56, %v4054_v55 }
 0x241   : > { %1502 = vmatpush.bf16.msra.mxu2 %v3616_v42  ;;  %v766_v42 = vadd.s32 24, %v4054_v55 }
 0x243   : > { %1295 = vmatmul.bf16.gmra.mxu3 %v4272_v51  ;;  %v804_v56 = vand.u32 15, %v766_v42  ;;  %v1105_v42 = vrot.slane %v4247_v32, 1  ;;  %2019 = vmatpush.bf16.msra.mxu1 %v3646_v37  ;;  %v3643_v37 = vld [vmem:[%s5141_s4 + $0x158] sm:$0xff] }
 0x244   : > { %3191 = vmatmul.msk.bf16.gmra.mxu2 %vm4277_vm12, %v4274_v52 }
 0x245   : > { %3176 = vmatmul.msk.bf16.gmra.mxu1 %vm4283_vm13, %v3175_v53  ;;  %v4353_v53 = vld [vmem:[#allocation2 + $0x88] sm:$0xff]  ;;  %vm990_vm7 = vcmp.lt.s32.totalorder %v804_v56, 15  ;;  %2267 = vmatpush.bf16.msrb.mxu2 %v3655_v27  ;;  %v1126_v56 = vsel %vm1116_vm14, %v1105_v42, %v1106_v43  ;;  %v1127_v57 = vsel %vm1116_vm14, %v4351_v49, %v1105_v42  ;;  %v1107_v27 = vrot.slane %v4305_v17, 1 }
 0x246   : > { %v4356_v50 = vrot.slane %v4353_v53, 7  ;;  %v4379_v21 = vpack.c.bf16 %v4066_v60, %v4353_v53  ;;  %vm4384_vm11 = vmpackc.low %vm990_vm7, %vm5150_vm3  ;;  %v4426_v32 = vpack.c.bf16 %v1126_v56, %v1127_v57  ;;  %v832_v42 = vand.u32 15, %v770_v26  ;;  %v3642_v56 = vld [vmem:[%s5141_s4 + $0x150] sm:$0xff]  ;;  %v4496_v26 = vld [vmem:[%s5141_s4 + $0x1f8] sm:$0xff] }
 0x247   : > { %2020 = vmatpush.bf16.msra.mxu1 %v3645_v45  ;;  %v1125_v17 = vsel %vm1116_vm14, %v1106_v43, %v1107_v27  ;;  %v4470_v57 = vpack.c.bf16 %v4158_v40, %v4156_v39  ;;  %v3641_v43 = vld [vmem:[%s5141_s4 + $0x148] sm:$0xff]  ;;  %2404 = vmatpush.bf16.msra.mxu0 %v4496_v26 }
 0x248   : > { %v1042_v29 = vsel %vm5146_vm0, %v4356_v50, %v1028_v13  ;;  %v4375_v18 = vsel %vm5146_vm0, %v1026_v20, %v4356_v50  ;;  %v3633_v20 = vld [vmem:[%s5141_s4 + $0x108] sm:$0xff]  ;;  %vm994_vm10 = vcmp.lt.s32.totalorder %v832_v42, 15 }
 0x249   : > { %v3181_v44 = vpack.c.bf16 %v1042_v29, %v4375_v18  ;;  %1887 = vmatpush.bf16.msrb.mxu3 %v3633_v20  ;;  %v3632_v29 = vld [vmem:[%s5141_s4 + $0x100] sm:$0xff]  ;;  %v3654_v20 = vld [vmem:[%s5141_s4 + $0x1b0] sm:$0xff] }
 0x24a   : > { %2268 = vmatpush.bf16.msrb.mxu2 %v3654_v20  ;;  %v3640_v20 = vld [vmem:[%s5141_s4 + $0x140] sm:$0xff] }
 0x24b   : > { %3288 = vmatmul.msk.bf16.gmra.mxu0 %vm4283_vm13, %v4332_v38 }
 0x24d   : > { %1888 = vmatpush.bf16.msrb.mxu3 %v3632_v29  ;;  %v3671_v29 = vld [vmem:[%s5141_s4 + $0x238] sm:$0xff] }
 0x251   : > { %2541 = vmatpush.bf16.msra.mxu3 %v3671_v29  ;;  %v4537_v29 = vld [vmem:[%s5141_s4 + $0x1f0] sm:$0xff] }
 0x252   : > { %2405 = vmatpush.bf16.msra.mxu0 %v4537_v29 }
 0x253   : > { %1300 = vmatmul.bf16.gmra.mxu3 %v4325_v28 }
 0x254   : > { %3226 = vmatmul.msk.bf16.vlgmr.msra.gmra.mxu2 %vm4328_vm2, %v3225_v34  ;;  %v768_v34 = vadd.s32 40, %v4054_v55 }
 0x255   : > { %3179 = vmatmul.msk.bf16.gmra.mxu1 %vm4335_vm6, %v4332_v38 }
 0x256   : > { %v818_v46 = vand.u32 15, %v768_v34  ;;  %v4452_v34 = vrot.slane %v4353_v53, 1 }
 0x258   : > { %vm992_vm1 = vcmp.lt.s32.totalorder %v818_v46, 15  ;;  %v1124_v46 = vsel %vm1116_vm14, %v1107_v27, %v4452_v34  ;;  %v1109_v27 = vrot.slane %v4066_v60, 1 }
 0x259   : > { %vm4429_vm7 = vmpackc.low %vm992_vm1, %vm5150_vm3  ;;  %v4472_v45 = vpack.c.bf16 %v1124_v46, %v1125_v17 }
 0x25a   : > { %v5198_v15 = vsel %vm4429_vm7, 4294967295, %v5197_v15  ;;  %vm4475_vm1 = vmpackc.low %vm994_vm10, %vm5150_vm3  ;;  %v1123_v60 = vsel %vm1116_vm14, %v4452_v34, %v1109_v27 }
 0x25b   : > { %3291 = vmatmul.msk.bf16.gmra.mxu0 %vm4335_vm6, %v3181_v44 }
 0x263   : > { %1305 = vmatmul.bf16.gmra.mxu3 %v4379_v21 }
 0x264   : > { %3229 = vmatmul.msk.bf16.gmra.mxu2 %vm4384_vm11, %v4381_v23 }
 0x265   : > { %3182 = vmatmul.msk.bf16.gmra.mxu1 %vm4390_vm15, %v3181_v44  ;;  %v3644_v44 = vld [vmem:[%s5141_s4 + $0x160] sm:$0xff] }
 0x266   : > { %2021 = vmatpush.bf16.msra.mxu1 %v3644_v44  ;;  %v772_v44 = vadd.s32 72, %v4054_v55 }
 0x268   : > { %v846_v42 = vand.u32 15, %v772_v44  ;;  %v1111_v44 = vrot.slane %v4070_v62, 1  ;;  %v3652_v62 = vld [vmem:[%s5141_s4 + $0x1a0] sm:$0xff] }
 0x26a   : > { %2022 = vmatpush.bf16.msra.mxu1 %v3643_v37  ;;  %v1110_v37 = vrot.slane %v4068_v61, 1  ;;  %vm996_vm10 = vcmp.lt.s32.totalorder %v846_v42, 15  ;;  %v4514_v61 = vpack.c.bf16 %v4072_v63, %v4236_v24  ;;  %v5211_v63 = vrot.slane %v4083_v11, 1  ;;  %v4691_v11 = vld [vmem:[#allocation2 + $0x90] sm:$0xff] }
 0x26b   : > { %3294 = vmatmul.msk.bf16.gmra.mxu0 %vm4390_vm15, %v4126_v30  ;;  %v5199_v30 = vmov 0  ;;  %vm4522_vm0 = vmpackc.low %vm996_vm10, %vm5150_vm3 }
 0x26c   : > { %v5200_v30 = vsel %vm4475_vm1, 4294967295, %v5199_v30  ;;  %v1122_v46 = vsel %vm1116_vm14, %v1109_v27, %v1110_v37 }
 0x26d   : > { %v4516_v17 = vpack.c.bf16 %v1122_v46, %v1123_v60  ;;  %v1121_v46 = vsel %vm1116_vm14, %v1110_v37, %v1111_v44  ;;  %v3661_v37 = vld [vmem:[%s5141_s4 + $0x1e8] sm:$0xff] }
 0x26e   : > { %2023 = vmatpush.bf16.msra.mxu1 %v3642_v56  ;;  %v3670_v56 = vld [vmem:[%s5141_s4 + $0x230] sm:$0xff]  ;;  %2406 = vmatpush.bf16.msra.mxu0 %v3661_v37 }
 0x26f   : > { %2542 = vmatpush.bf16.msra.mxu3 %v3670_v56  ;;  %v3669_v56 = vld [vmem:[%s5141_s4 + $0x228] sm:$0xff] }
 0x272   : > { %2024 = vmatpush.bf16.msra.mxu1 %v3641_v43  ;;  %v774_v43 = vadd.s32 88, %v4054_v55 }
 0x273   : > { %1310 = vmatmul.bf16.gmra.mxu3 %v4424_v59 }
 0x274   : > { %3232 = vmatmul.msk.bf16.gmra.mxu2 %vm4429_vm7, %v4426_v32  ;;  %v860_v27 = vand.u32 15, %v774_v43  ;;  %v776_v43 = vadd.s32 104, %v4054_v55  ;;  %2543 = vmatpush.bf16.msra.mxu3 %v3669_v56  ;;  %v1113_v56 = vrot.slane %v4158_v40, 1  ;;  %v3659_v40 = vld [vmem:[%s5141_s4 + $0x1d8] sm:$0xff] }
 0x276   : > { %2025 = vmatpush.bf16.msra.mxu1 %v3640_v20  ;;  %v1112_v20 = vrot.slane %v4156_v39, 1  ;;  %vm998_vm10 = vcmp.lt.s32.totalorder %v860_v27, 15 }
 0x278   : > { %v1120_v42 = vsel %vm1116_vm14, %v1111_v44, %v1112_v20  ;;  %v4576_v44 = vld [vmem:[#allocation2 + $0x98] sm:$0xff] }
 0x279   : > { %3370 = vmatmul.msk.bf16.vlgmr.msra.gmra.mxu1 %vm4328_vm2, %v4381_v23  ;;  %v5201_v23 = vmov 0  ;;  %v4555_v39 = vpack.c.bf16 %v1120_v42, %v1121_v46  ;;  %vm4558_vm2 = vmpackc.low %vm998_vm10, %vm5150_vm3  ;;  %v3650_v46 = vld [vmem:[%s5141_s4 + $0x190] sm:$0xff]  ;;  %vm5206_vm10 = vcmp.lt.s32.totalorder %v4054_v55, 1 }
 0x27a   : > { %v5202_v23 = vsel %vm4522_vm0, 4294967295, %v5201_v23  ;;  %vm5207_vm3 = vmmov %vm5206_vm10 }
 0x27b   : > { %3297 = vmatmul.msk.bf16.gmra.mxu0 %vm4129_vm4, %v4203_v10  ;;  %v3653_v10 = vld [vmem:[%s5141_s4 + $0x1a8] sm:$0xff]  ;;  %5203 = vst [vmem:[#allocation21_spill] sm:$0xff] %v5202_v23  ;;  %v4723_v23 = vld [vmem:[#allocation2] sm:$0xff] }
 0x27c   : > { %2269 = vmatpush.bf16.msrb.mxu2 %v3653_v10  ;;  %v3651_v10 = vld [vmem:[%s5141_s4 + $0x198] sm:$0xff]  ;;  %v2334_v33 = vpack.c.bf16 %v4723_v23, %v4353_v53  ;;  %v2152_v12 = vrot.slane %v4723_v23, 1 }
 0x280   : > { %2270 = vmatpush.bf16.msrb.mxu2 %v3652_v62  ;;  %v4587_v62 = vrot.slane %v4576_v44, 7 }
 0x282   : > { %v1592_v9 = vsel %vm5206_vm10, %v4587_v62, %v1591_v25  ;;  %v1593_v8 = vsel %vm5207_vm3, %v4094_v19, %v4587_v62  ;;  %v1118_v19 = vsel %vm1116_vm14, %v1113_v56, %v1114_v58  ;;  %v1119_v25 = vsel %vm1116_vm14, %v1112_v20, %v1113_v56 }
 0x283   : > { %1315 = vmatmul.bf16.gmra.mxu3 %v4470_v57  ;;  %vm5208_vm10 = vmmov 1  }
 0x284   : > { %3235 = vmatmul.msk.bf16.gmra.mxu2 %vm4475_vm1, %v4472_v45 }
 0x285   : > { %2271 = vmatpush.bf16.msrb.mxu2 %v3651_v10 }
 0x289   : > { %3373 = vmatmul.msk.bf16.gmra.mxu1 %vm4384_vm11, %v4426_v32  ;;  %2272 = vmatpush.bf16.msrb.mxu2 %v3650_v46  ;;  %v3302_v46 = vpack.c.bf16 %v1592_v9, %v1593_v8  ;;  %v3648_v8 = vld [vmem:[%s5141_s4 + $0x180] sm:$0xff]  ;;  %v3658_v9 = vld [vmem:[%s5141_s4 + $0x1d0] sm:$0xff] }
 0x28b   : > { %3300 = vmatmul.msk.bf16.gmra.mxu0 %vm4206_vm8, %v4274_v52 }
 0x293   : > { %1320 = vmatmul.bf16.gmra.mxu3 %v4514_v61 }
 0x294   : > { %3238 = vmatmul.msk.bf16.gmra.mxu2 %vm4522_vm0, %v4516_v17 }
 0x299   : > { %3376 = vmatmul.msk.bf16.gmra.mxu1 %vm4429_vm7, %v4472_v45 }
 0x29b   : > { %3303 = vmatmul.msk.bf16.gmra.mxu0 %vm4277_vm12, %v3302_v46  ;;  %v4629_v46 = vpack.c.bf16 %v1118_v19, %v1119_v25  ;;  %v778_v19 = vadd.s32 120, %v4054_v55 }
 0x29d   : > { %v888_v2 = vand.u32 15, %v778_v19 }
 0x2a2   : > { %v1383_v60 = vpop.f32.mrf.mxu1 }
 0x2a3   : > { %1889 = vmatmul.bf16.vlgmr.msrb.gmra.mxu3 %v4201_v1  ;;  %v3660_v1 = vld [vmem:[%s5141_s4 + $0x1e0] sm:$0xff] }
 0x2a4   : > { %3241 = vmatmul.msk.bf16.gmra.mxu2 %vm4558_vm2, %v4555_v39  ;;  %2407 = vmatpush.bf16.msra.mxu0 %v3660_v1 }
 0x2a6   : > { %v1286_v27 = vpop.f32.mrf.mxu3 }
 0x2a7   : > { %v4578_v42 = vpop.f32.mrf.mxu2  ;;  %v4589_v10 = vadd.f32 %v1383_v60, %v1286_v27  ;;  %v3649_v60 = vld [vmem:[%s5141_s4 + $0x188] sm:$0xff]  ;;  %v874_v27 = vand.u32 15, %v776_v43 }
 0x2a8   : > { %2273 = vmatpush.bf16.msrb.mxu2 %v3649_v60  ;;  %2408 = vmatpush.bf16.msra.mxu0 %v3659_v40  ;;  %v3657_v60 = vld [vmem:[%s5141_s4 + $0x1c8] sm:$0xff]  ;;  %v1753_v4 = vpop.f32.mrf.mxu0 }
 0x2a9   : > { %vm1000_vm3 = vcmp.lt.s32.totalorder %v874_v27, 15  ;;  %v3668_v27 = vld [vmem:[%s5141_s4 + $0x220] sm:$0xff]  ;;  %3379 = vmatmul.msk.bf16.gmra.mxu1 %vm4475_vm1, %v4516_v17 }
 0x2aa   : > { %v4608_v24 = vpop.f32.mrf.mxu1  ;;  %vm4632_vm7 = vmpackc.low %vm1000_vm3, %vm5208_vm10  ;;  %2544 = vmatpush.bf16.msra.mxu3 %v3668_v27  ;;  %vm1002_vm3 = vcmp.lt.s32.totalorder %v888_v2, 15  ;;  %v3667_v2 = vld [vmem:[%s5141_s4 + $0x218] sm:$0xff] }
 0x2ab   : > { %vm4681_vm1 = vmpackc.low %vm1002_vm3, %vm5208_vm10  ;;  %vm5214_vm10 = vcmp.lt.s32.totalorder %v4054_v55, 1 }
 0x2ac   : > { %2274 = vmatpush.bf16.msrb.mxu2 %v3648_v8  ;;  %2409 = vmatpush.bf16.msra.mxu0 %v3658_v9  ;;  %v3656_v8 = vld [vmem:[%s5141_s4 + $0x1c0] sm:$0xff] }
 0x2ae   : > { %v4619_v7 = vpop.f32.mrf.mxu3  ;;  %2545 = vmatpush.bf16.msra.mxu3 %v3667_v2 }
 0x2af   : > { %v4621_v43 = vpop.f32.mrf.mxu2 }
 0x2b0   : > { %3735 = vmatpush.bf16.msra.mxu2 %v4496_v26  ;;  %2410 = vmatpush.bf16.msra.mxu0 %v3657_v60  ;;  %v1755_v19 = vpop.f32.mrf.mxu0 }
 0x2b2   : > { %v1388_v56 = vpop.f32.mrf.mxu1 }
 0x2b3   : > { %1894 = vmatmul.bf16.gmra.mxu3 %v4272_v51 }
 0x2b4   : > { %3244 = vmatmul.msk.bf16.gmra.mxu2 %vm4632_vm7, %v4629_v46  ;;  %2411 = vmatpush.bf16.msra.mxu0 %v3656_v8 }
 0x2b5   : > { %3736 = vmatpush.bf16.msra.mxu2 %v4537_v29  ;;  %v4668_v29 = vsel %vm1116_vm14, %v1114_v58, %v4657_v5 }
 0x2b6   : > { %v1291_v26 = vpop.f32.mrf.mxu3 }
 0x2b7   : > { %v4649_v25 = vpop.f32.mrf.mxu2  ;;  %v4654_v6 = vadd.f32 %v1388_v56, %v1291_v26  ;;  %2412 = vmatmul.bf16.vlgmr.msra.gmra.mxu0 %v4272_v51  ;;  %v1132_v56 = vsel %vm1116_vm14, %v4657_v5, %v5211_v63 }
 0x2b8   : > { %v3246_v17 = vpack.c.bf16 %v1132_v56, %v4668_v29 }
 0x2b9   : > { %3737 = vmatpush.bf16.msra.mxu2 %v3661_v37  ;;  %3382 = vmatmul.msk.bf16.gmra.mxu1 %vm4522_vm0, %v4555_v39 }
 0x2ba   : > { %v4659_v3 = vpop.f32.mrf.mxu1 }
 0x2bd   : > { %3738 = vmatpush.bf16.msra.mxu2 %v3660_v1 }
 0x2be   : > { %v4675_v37 = vpop.f32.mrf.mxu3 }
 0x2bf   : > { %v4677_v27 = vpop.f32.mrf.mxu2 }
 0x2c1   : > { %3739 = vmatpush.bf16.msra.mxu2 %v3659_v40  ;;  %v5161_v40 = vrot.slane %v4691_v11, 7 }
 0x2c2   : > { %v1393_v58 = vpop.f32.mrf.mxu1 }
 0x2c3   : > { %1899 = vmatmul.bf16.gmra.mxu3 %v4325_v28 }
 0x2c4   : > { %3247 = vmatmul.msk.bf16.gmra.mxu2 %vm4681_vm1, %v3246_v17  ;;  %v1758_v17 = vpop.f32.mrf.mxu0 }
 0x2c5   : > { %3740 = vmatpush.bf16.msra.mxu2 %v3658_v9  ;;  %v2130_v9 = vsel %vm5214_vm10, %v5161_v40, %v4250_v36 }
 0x2c6   : > { %v1296_v1 = vpop.f32.mrf.mxu3 }
 0x2c7   : > { %v4693_v26 = vpop.f32.mrf.mxu2  ;;  %v4695_v63 = vadd.f32 %v1393_v58, %v1296_v1  ;;  %2417 = vmatmul.bf16.gmra.mxu0 %v4325_v28  ;;  %v3666_v28 = vld [vmem:[%s5141_s4 + $0x210] sm:$0xff] }
 0x2c8   : > { %2546 = vmatpush.bf16.msra.mxu3 %v3666_v28 }
 0x2c9   : > { %3741 = vmatpush.bf16.msra.mxu2 %v3657_v60  ;;  %v3425_v60 = vpack.c.bf16 %v4266_v48, %v2130_v9  ;;  %3385 = vmatmul.msk.bf16.gmra.mxu1 %vm4558_vm2, %v4629_v46  ;;  %v1386_v9 = vadd.f32 %v4608_v24, %v4619_v7  ;;  %v4748_v46 = vrot.slane %v4576_v44, 1 }
 0x2ca   : > { %v4698_v56 = vpop.f32.mrf.mxu1 }
 0x2cc   : > { %v1760_v39 = vpop.f32.mrf.mxu0 }
 0x2cd   : > { %3742 = vmatpush.bf16.msra.mxu2 %v3656_v8 }
 0x2ce   : > { %v4709_v58 = vpop.f32.mrf.mxu3 }
 0x2cf   : > { %v4711_v2 = vpop.f32.mrf.mxu2 }
 0x2d2   : > { %v1398_v1 = vpop.f32.mrf.mxu1 }
 0x2d3   : > { %1904 = vmatmul.bf16.gmra.mxu3 %v4379_v21 }
 0x2d4   : > { %3426 = vmatmul.msk.bf16.vlgmr.msrb.gmra.mxu2 %vm4134_vm5, %v3425_v60  ;;  %v1763_v28 = vpop.f32.mrf.mxu0  ;;  %vm5215_vm5 = vmmov %vm5214_vm10 }
 0x2d5   : > { %vm5219_vm3 = vmmov %vm5215_vm5 }
 0x2d6   : > { %v1301_v36 = vpop.f32.mrf.mxu3  ;;  %vm5221_vm10 = vmmov %vm5219_vm3 }
 0x2d7   : > { %v1504_v8 = vpop.f32.mrf.mxu2  ;;  %v4720_v40 = vadd.f32 %v1398_v1, %v1301_v36  ;;  %2422 = vmatmul.bf16.gmra.mxu0 %v2334_v33 }
 0x2d8   : > { %v1544_v49 = vadd.f32 %v1504_v8, %v4589_v10  ;;  %v4754_v8 = vld [vmem:[#allocation2 + $0x18] sm:$0xff] }
 0x2da   : > { %v4725_v48 = vadd.f32 %v1753_v4, %v1544_v49  ;;  %v4729_v21 = vpop.f32.mrf.mxu1  ;;  %v3665_v49 = vld [vmem:[%s5141_s4 + $0x208] sm:$0xff] }
 0x2db   : > { %2547 = vmatpush.bf16.msra.mxu3 %v3665_v49  ;;  %v1391_v49 = vadd.f32 %v4659_v3, %v4675_v37 }
 0x2de   : > { %v4736_v60 = vpop.f32.mrf.mxu3 }
 0x2df   : > { %v1506_v10 = vpop.f32.mrf.mxu2 }
 0x2e0   : > { %v1545_v1 = vadd.f32 %v1506_v10, %v1386_v9  ;;  %v1765_v9 = vpop.f32.mrf.mxu0 }
 0x2e2   : > { %v4738_v4 = vadd.f32 %v1755_v19, %v1545_v1  ;;  %v1403_v53 = vpop.f32.mrf.mxu1  ;;  %v2335_v1 = vpack.c.bf16 %v4756_v16, %v4754_v8 }
 0x2e3   : > { %1909 = vmatmul.bf16.gmra.mxu3 %v4424_v59  ;;  %v2104_v59 = vrot.slane %v4723_v23, 7 }
 0x2e4   : > { %3429 = vmatmul.msk.bf16.gmra.mxu2 %vm4211_vm9, %v4332_v38  ;;  %v1641_v38 = vsel %vm1116_vm14, %v4657_v5, %v4748_v46  ;;  %vm5216_vm9 = vmmov %vm5215_vm5 }
 0x2e5   : > { %v3387_v10 = vpack.c.bf16 %v1641_v38, %v4668_v29  ;;  %v4791_v38 = vld [vmem:[#allocation2 + $0x38] sm:$0xff] }
 0x2e6   : > { %v1306_v7 = vpop.f32.mrf.mxu3 }
 0x2e7   : > { %v1509_v24 = vpop.f32.mrf.mxu2  ;;  %v4750_v36 = vadd.f32 %v1403_v53, %v1306_v7  ;;  %3388 = vmatmul.msk.bf16.gmra.mxu1 %vm4632_vm7, %v3387_v10  ;;  %2427 = vmatmul.bf16.gmra.mxu0 %v2335_v1 }
 0x2e8   : > { %v1546_v19 = vadd.f32 %v1509_v24, %v4654_v6  ;;  %v2125_v6 = vsel %vm5215_vm5, %v4356_v50, %v2104_v59  ;;  %v1768_v24 = vpop.f32.mrf.mxu0  ;;  %v3664_v50 = vld [vmem:[%s5141_s4 + $0x200] sm:$0xff] }
 0x2e9   : > { %v3431_v29 = vpack.c.bf16 %v2125_v6, %v4375_v18  ;;  %2548 = vmatpush.bf16.msra.mxu3 %v3664_v50 }
 0x2ea   : > { %v4762_v33 = vadd.f32 %v1758_v17, %v1546_v19  ;;  %v1639_v19 = vrot.slane %v4233_v22, 1 }
 0x2ec   : > { %v1640_v10 = vsel %vm1116_vm14, %v4748_v46, %v1639_v19  ;;  %v1655_v1 = vsel %vm1116_vm14, %v1639_v19, %v4301_v0 }
 0x2ee   : > { %v4774_v5 = vpop.f32.mrf.mxu3 }
 0x2ef   : > { %v1511_v17 = vpop.f32.mrf.mxu2 }
 0x2f0   : > { %v1547_v53 = vadd.f32 %v1511_v17, %v1391_v49  ;;  %v3390_v49 = vpack.c.bf16 %v1655_v1, %v1640_v10  ;;  %v1770_v0 = vpop.f32.mrf.mxu0 }
 0x2f2   : > { %v4777_v7 = vadd.f32 %v1760_v39, %v1547_v53  ;;  %v2105_v39 = vrot.slane %v4754_v8, 7 }
 0x2f3   : > { %1914 = vmatmul.bf16.gmra.mxu3 %v4470_v57  ;;  %v2106_v57 = vrot.slane %v4756_v16, 7 }
 0x2f4   : > { %3432 = vmatmul.msk.bf16.gmra.mxu2 %vm4283_vm13, %v3431_v29  ;;  %vm5217_vm13 = vmmov %vm5215_vm5  ;;  %v1396_v29 = vadd.f32 %v4698_v56, %v4709_v58  ;;  %v2107_v56 = vrot.slane %v4791_v38, 7  ;;  %v2108_v58 = vrot.slane %v4793_v54, 7 }
 0x2f5   : > { %v2123_v17 = vsel %vm5216_vm9, %v2105_v39, %v2106_v57  ;;  %v2124_v53 = vsel %vm5217_vm13, %v2104_v59, %v2105_v39  ;;  %vm5224_vm9 = vmmov %vm5219_vm3  ;;  %vm5228_vm13 = vnez %v5198_v15 }
 0x2f6   : > { %v4785_v3 = vpop.f32.mrf.mxu3  ;;  %v3434_v19 = vpack.c.bf16 %v2123_v17, %v2124_v53  ;;  %v1401_v17 = vadd.f32 %v4729_v21, %v4736_v60  ;;  %v3679_v60 = vld [vmem:[%s5143_s6 + $0x38] sm:$0xff] }
 0x2f7   : > { %v1514_v37 = vpop.f32.mrf.mxu2  ;;  %3391 = vmatmul.msk.bf16.gmra.mxu1 %vm4681_vm1, %v3390_v49  ;;  %v4825_v49 = vld [vmem:[#allocation2 + $0x68] sm:$0xff] }
 0x2f8   : > { %v1548_v18 = vadd.f32 %v1514_v37, %v4695_v63  ;;  %v2336_v63 = vpack.c.bf16 %v4793_v54, %v4791_v38  ;;  %v1773_v39 = vpop.f32.mrf.mxu0  ;;  %2718 = vmatpush.bf16.msrb.mxu1 %v3679_v60 }
 0x2fa   : > { %v4801_v6 = vadd.f32 %v1763_v28, %v1548_v18  ;;  %2432 = vmatmul.bf16.gmra.mxu0 %v2336_v63  ;;  %v4827_v63 = vld [vmem:[#allocation2 + $0x20] sm:$0xff] }
 0x2fb   : > { %v2337_v41 = vpack.c.bf16 %v4827_v63, %v4825_v49 }
 0x2fe   : > { %v4813_v28 = vpop.f32.mrf.mxu3 }
 0x2ff   : > { %v1516_v50 = vpop.f32.mrf.mxu2 }
 0x300   : > { %v1549_v37 = vadd.f32 %v1516_v50, %v1396_v29 }
 0x302   : > { %v4815_v18 = vadd.f32 %v1765_v9, %v1549_v37 }
 0x303   : > { %1919 = vmatmul.bf16.gmra.mxu3 %v4514_v61 }
 0x304   : > { %3435 = vmatmul.msk.bf16.gmra.mxu2 %vm4335_vm6, %v3434_v19  ;;  %vm5218_vm6 = vmmov %vm5215_vm5  ;;  %vm5222_vm5 = vnez %v5189_v35 }
 0x305   : > { %v2121_v61 = vsel %vm5218_vm6, %v2107_v56, %v2108_v58 }
 0x306   : > { %v4820_v10 = vpop.f32.mrf.mxu3 }
 0x307   : > { %v1519_v1 = vpop.f32.mrf.mxu2 }
 0x308   : > { %v1550_v59 = vadd.f32 %v1519_v1, %v4720_v40  ;;  %v2122_v40 = vsel %vm5219_vm3, %v2106_v57, %v2107_v56  ;;  %v1775_v1 = vpop.f32.mrf.mxu0  ;;  %v2109_v56 = vrot.slane %v4825_v49, 7 }
 0x309   : > { %v3437_v37 = vpack.c.bf16 %v2121_v61, %v2122_v40  ;;  %v1405_v61 = vpop.f32.mrf.mxu1 }
 0x30a   : > { %v4829_v9 = vadd.f32 %v1768_v24, %v1550_v59  ;;  %2437 = vmatmul.bf16.gmra.mxu0 %v2337_v41  ;;  %v1816_v24 = vpack.c.bf16 %v4233_v22, %v4576_v44  ;;  %v2110_v22 = vrot.slane %v4827_v63, 7 }
 0x30e   : > { %v4839_v53 = vpop.f32.mrf.mxu3 }
 0x30f   : > { %v1521_v29 = vpop.f32.mrf.mxu2  ;;  %v1416_v23 = vadd.f32 %v4677_v27, %v4839_v53 }
 0x310   : > { %v1551_v50 = vadd.f32 %v1521_v29, %v1401_v17  ;;  %v1778_v40 = vpop.f32.mrf.mxu0  ;;  %v2120_v17 = vsel %vm5221_vm10, %v2108_v58, %v2109_v56  ;;  %v1406_v29 = vadd.f32 %v1405_v61, %v4774_v5  ;;  %v2153_v61 = vrot.slane %v4754_v8, 1  ;;  %v4913_v8 = vld [vmem:[#allocation2 + $0x80] sm:$0xff] }
 0x312   : > { %v4843_v19 = vadd.f32 %v1770_v0, %v1551_v50  ;;  %v4855_v0 = vld [vmem:[#allocation2 + $0x70] sm:$0xff] }
 0x313   : > { %1924 = vmatmul.bf16.gmra.mxu3 %v1816_v24  ;;  %v2338_v13 = vpack.c.bf16 %v4855_v0, %v4576_v44  ;;  %v1409_v44 = vadd.f32 %v4578_v42, %v4785_v3  ;;  %v2112_v31 = vrot.slane %v4855_v0, 7  ;;  %v1411_v42 = vadd.f32 %v4621_v43, %v4813_v28 }
 0x314   : > { %3438 = vmatmul.msk.bf16.gmra.mxu2 %vm4390_vm15, %v3437_v37  ;;  %vm5220_vm15 = vmmov %vm5219_vm3 }
 0x316   : > { %v4847_v59 = vpop.f32.mrf.mxu3 }
 0x317   : > { %v1524_v57 = vpop.f32.mrf.mxu2 }
 0x318   : > { %v1552_v21 = vadd.f32 %v1524_v57, %v4750_v36  ;;  %v2119_v36 = vsel %vm5220_vm15, %v2109_v56, %v2110_v22  ;;  %v1780_v58 = vpop.f32.mrf.mxu0 }
 0x319   : > { %v3440_v37 = vpack.c.bf16 %v2119_v36, %v2120_v17  ;;  %v2154_v36 = vrot.slane %v4756_v16, 1 }
 0x31a   : > { %v4857_v41 = vadd.f32 %v1773_v39, %v1552_v21  ;;  %2442 = vmatmul.bf16.gmra.mxu0 %v2338_v13 }
 0x31b   : > { %v2171_v43 = vsel %vm1116_vm14, %v2153_v61, %v2154_v36 }
 0x31e   : > { %v4866_v50 = vpop.f32.mrf.mxu3 }
 0x31f   : > { %v1526_v24 = vpop.f32.mrf.mxu2  ;;  %v1421_v47 = vadd.f32 %v4711_v2, %v4866_v50  ;;  %v3675_v2 = vld [vmem:[%s5143_s6 + $0x18] sm:$0xff] }
 0x320   : > { %v1553_v39 = vadd.f32 %v1526_v24, %v1406_v29 }
 0x322   : > { %v4868_v57 = vadd.f32 %v1775_v1, %v1553_v39  ;;  %v3678_v1 = vld [vmem:[%s5143_s6 + $0x30] sm:$0xff]  ;;  %v1783_v39 = vpop.f32.mrf.mxu0 }
 0x323   : > { %3514 = vmatmul.msk.bf16.vlgmr.msra.gmra.mxu3 %vm5222_vm5, %v4426_v32  ;;  %2719 = vmatpush.bf16.msrb.mxu1 %v3678_v1  ;;  %v2118_v32 = vsel %vm5224_vm9, %v2110_v22, %v4587_v62 }
 0x324   : > { %3441 = vmatmul.msk.bf16.gmra.mxu2 %vm4129_vm4, %v3440_v37  ;;  %vm5223_vm4 = vmmov %vm5219_vm3 }
 0x325   : > { %v2117_v35 = vsel %vm5223_vm4, %v4587_v62, %v2112_v31 }
 0x326   : > { %v1890_v5 = vpop.f32.mrf.mxu3  ;;  %v3443_v24 = vpack.c.bf16 %v2117_v35, %v2118_v32  ;;  %v2156_v32 = vrot.slane %v4793_v54, 1 }
 0x327   : > { %v1529_v21 = vpop.f32.mrf.mxu2  ;;  %v4878_v56 = vadd.f32 %v1890_v5, %v4725_v48  ;;  %2720 = vmatpush.bf16.msrb.mxu1 %v3677_v14  ;;  %v2172_v5 = vsel %vm1116_vm14, %v2152_v12, %v2153_v61 }
 0x328   : > { %v1554_v60 = vadd.f32 %v1529_v21, %v1409_v44 }
 0x32a   : > { %v4884_v13 = vadd.f32 %v1778_v40, %v1554_v60  ;;  %v2155_v40 = vrot.slane %v4791_v38, 1  ;;  %v1785_v21 = vpop.f32.mrf.mxu0  ;;  %v2173_v60 = vsel %vm1116_vm14, %v4452_v34, %v2152_v12 }
 0x32c   : > { %v2170_v62 = vsel %vm1116_vm14, %v2154_v36, %v2155_v40  ;;  %v3519_v36 = vpack.c.bf16 %v2172_v5, %v2173_v60  ;;  %v2169_v34 = vsel %vm1116_vm14, %v2155_v40, %v2156_v32  ;;  %v3676_v40 = vld [vmem:[%s5143_s6 + $0x20] sm:$0xff]  ;;  %v3673_v5 = vld [vmem:[%s5143_s6 + $0x8] sm:$0xff]  ;;  %v2160_v60 = vrot.slane %v4855_v0, 1 }
 0x32d   : > { %v3522_v22 = vpack.c.bf16 %v2170_v62, %v2171_v43  ;;  %2721 = vmatpush.bf16.msrb.mxu1 %v3676_v40 }
 0x32e   : > { %v1892_v3 = vpop.f32.mrf.mxu3  ;;  %v2165_v52 = vsel %vm1116_vm14, %v4748_v46, %v2160_v60 }
 0x32f   : > { %v1531_v48 = vpop.f32.mrf.mxu2  ;;  %v4898_v29 = vadd.f32 %v1892_v3, %v4738_v4  ;;  %v1414_v4 = vadd.f32 %v4649_v25, %v4820_v10  ;;  %v5225_v25 = vrot.slane %v4691_v11, 7 }
 0x330   : > { %v1555_v17 = vadd.f32 %v1531_v48, %v1411_v42  ;;  %v2157_v42 = vrot.slane %v4825_v49, 1 }
 0x331   : > { %2722 = vmatpush.bf16.msrb.mxu1 %v3675_v2 }
 0x332   : > { %v4904_v28 = vadd.f32 %v1780_v58, %v1555_v17  ;;  %v2113_v58 = vrot.slane %v4913_v8, 7  ;;  %v2168_v61 = vsel %vm1116_vm14, %v2156_v32, %v2157_v42  ;;  %v1788_v54 = vpop.f32.mrf.mxu0 }
 0x333   : > { %3517 = vmatmul.msk.bf16.gmra.mxu3 %vm4384_vm11, %v4472_v45  ;;  %vm5227_vm11 = vmmov %vm5219_vm3  ;;  %v3525_v27 = vpack.c.bf16 %v2168_v61, %v2169_v34  ;;  %v5231_v34 = vld [vmem:[#allocation20_spill] sm:$0xff] }
 0x334   : > { %3444 = vmatmul.msk.bf16.gmra.mxu2 %vm4206_vm8, %v3443_v24  ;;  %vm5226_vm8 = vmmov %vm5219_vm3 }
 0x335   : > { %v2115_v10 = vsel %vm5226_vm8, %v2113_v58, %v5225_v25 }
 0x336   : > { %v1895_v38 = vpop.f32.mrf.mxu3 }
 0x337   : > { %v1534_v16 = vpop.f32.mrf.mxu2  ;;  %v4916_v44 = vadd.f32 %v1895_v38, %v4762_v33  ;;  %v2116_v33 = vsel %vm5227_vm11, %v2112_v31, %v2113_v58 }
 0x338   : > { %v1556_v37 = vadd.f32 %v1534_v16, %v1414_v4  ;;  %v3446_v31 = vpack.c.bf16 %v2115_v10, %v2116_v33 }
 0x33a   : > { %v4923_v45 = vadd.f32 %v1783_v39, %v1556_v37  ;;  %v1790_v15 = vpop.f32.mrf.mxu0 }
 0x33e   : > { %v1897_v35 = vpop.f32.mrf.mxu3 }
 0x33f   : > { %v1536_v1 = vpop.f32.mrf.mxu2  ;;  %v4941_v3 = vadd.f32 %v1897_v35, %v4777_v7  ;;  %v1419_v7 = vadd.f32 %v4693_v26, %v4847_v59 }
 0x340   : > { %v1557_v48 = vadd.f32 %v1536_v1, %v1416_v23  ;;  %v2161_v23 = vrot.slane %v4913_v8, 1 }
 0x342   : > { %v4947_v17 = vadd.f32 %v1785_v21, %v1557_v48  ;;  %v2164_v1 = vsel %vm1116_vm14, %v2160_v60, %v2161_v23 }
 0x343   : > { %3520 = vmatmul.msk.bf16.gmra.mxu3 %vm5228_vm13, %v3519_v36  ;;  %v3531_v32 = vpack.c.bf16 %v2164_v1, %v2165_v52  ;;  %v2162_v36 = vrot.slane %v4691_v11, 1 }
 0x344   : > { %3447 = vmatmul.msk.bf16.gmra.mxu2 %vm4277_vm12, %v3446_v31  ;;  %vm5229_vm12 = vnez %v5200_v30  ;;  %v2413_v31 = vpop.f32.mrf.mxu0 }
 0x345   : > { %v2178_v20 = vsel %vm1116_vm14, %v2162_v36, %v5231_v34 }
 0x346   : > { %v1900_v53 = vpop.f32.mrf.mxu3 }
 0x347   : > { %v1539_v49 = vpop.f32.mrf.mxu2  ;;  %v4956_v39 = vadd.f32 %v1900_v53, %v4801_v6  ;;  %v2339_v6 = vpack.c.bf16 %v4691_v11, %v4913_v8 }
 0x348   : > { %v1558_v24 = vadd.f32 %v1539_v49, %v1419_v7 }
 0x34a   : > { %v4961_v62 = vadd.f32 %v1788_v54, %v1558_v24 }
 0x34c   : > { %v2415_v11 = vpop.f32.mrf.mxu0 }
 0x34e   : > { %v1902_v4 = vpop.f32.mrf.mxu3 }
 0x34f   : > { %v1541_v43 = vpop.f32.mrf.mxu2  ;;  %v4966_v59 = vadd.f32 %v1902_v4, %v4815_v18 }
 0x350   : > { %v1559_v26 = vadd.f32 %v1541_v43, %v1421_v47 }
 0x352   : > { %v1808_v16 = vadd.f32 %v1790_v15, %v1559_v26 }
 0x353   : > { %3523 = vmatmul.msk.bf16.gmra.mxu3 %vm5229_vm12, %v3522_v22  ;;  %v2158_v22 = vrot.slane %v4827_v63, 1 }
 0x354   : > { %2447 = vmatmul.bf16.vlgmr.msra.gmra.mxu2 %v2339_v6  ;;  %v2418_v47 = vpop.f32.mrf.mxu0 }
 0x355   : > { %v2166_v12 = vsel %vm1116_vm14, %v2158_v22, %v4748_v46  ;;  %v3672_v46 = vld [vmem:[%s5143_s6] sm:$0xff] }
 0x356   : > { %v1905_v38 = vpop.f32.mrf.mxu3 }
 0x357   : > { %v4973_v37 = vadd.f32 %v1905_v38, %v4829_v9  ;;  %v3674_v9 = vld [vmem:[%s5143_s6 + $0x10] sm:$0xff]  ;;  %v2276_v10 = vpop.f32.mrf.mxu2 }
 0x358   : > { %2723 = vmatpush.bf16.msrb.mxu1 %v3674_v9 }
 0x35c   : > { %2724 = vmatpush.bf16.msrb.mxu1 %v3673_v5  ;;  %v2420_v6 = vpop.f32.mrf.mxu0 }
 0x35e   : > { %v1907_v50 = vpop.f32.mrf.mxu3 }
 0x35f   : > { %v4979_v18 = vadd.f32 %v1907_v50, %v4843_v19  ;;  %v2167_v19 = vsel %vm1116_vm14, %v2157_v42, %v2158_v22  ;;  %v2027_v42 = vpop.f32.mrf.mxu1 }
 0x360   : > { %2725 = vmatpush.bf16.msrb.mxu1 %v3672_v46 }
 0x363   : > { %3526 = vmatmul.msk.bf16.gmra.mxu3 %vm4522_vm0, %v3525_v27 }
 0x366   : > { %v1910_v58 = vpop.f32.mrf.mxu3 }
 0x367   : > { %v4984_v30 = vadd.f32 %v1910_v58, %v4857_v41  ;;  %v3528_v41 = vpack.c.bf16 %v2166_v12, %v2167_v19  ;;  %v2029_v61 = vpop.f32.mrf.mxu1  ;;  %v2423_v19 = vpop.f32.mrf.mxu0 }
 0x368   : > { %v2068_v51 = vadd.f32 %v2029_v61, %v4898_v29 }
 0x36e   : > { %v1912_v21 = vpop.f32.mrf.mxu3 }
 0x36f   : > { %v4996_v25 = vadd.f32 %v1912_v21, %v4868_v57  ;;  %v2278_v57 = vpop.f32.mrf.mxu2  ;;  %v2032_v49 = vpop.f32.mrf.mxu1 }
 0x370   : > { %v2317_v14 = vadd.f32 %v2278_v57, %v2068_v51  ;;  %v2069_v29 = vadd.f32 %v2032_v49, %v4916_v44 }
 0x373   : > { %3529 = vmatmul.msk.bf16.gmra.mxu3 %vm4558_vm2, %v3528_v41 }
 0x376   : > { %v1915_v33 = vpop.f32.mrf.mxu3 }
 0x377   : > { %v5001_v63 = vadd.f32 %v1915_v33, %v4884_v13  ;;  %v2281_v0 = vpop.f32.mrf.mxu2  ;;  %v2034_v55 = vpop.f32.mrf.mxu1 }
 0x378   : > { %v2318_v5 = vadd.f32 %v2281_v0, %v2069_v29  ;;  %v2070_v1 = vadd.f32 %v2034_v55, %v4941_v3 }
 0x37a   : > { %v2455_v52 = vadd.f32 %v2418_v47, %v2318_v5 }
 0x37e   : > { %v1917_v35 = vpop.f32.mrf.mxu3 }
 0x37f   : > { %v5014_v13 = vadd.f32 %v1917_v35, %v4904_v28  ;;  %v2163_v28 = vsel %vm1116_vm14, %v2161_v23, %v2162_v36  ;;  %v2283_v27 = vpop.f32.mrf.mxu2  ;;  %v2037_v2 = vpop.f32.mrf.mxu1 }
 0x380   : > { %v3534_v7 = vpack.c.bf16 %v2178_v20, %v2163_v28  ;;  %v2319_v35 = vadd.f32 %v2283_v27, %v2070_v1  ;;  %v2071_v0 = vadd.f32 %v2037_v2, %v4956_v39 }
 0x383   : > { %3532 = vmatmul.msk.bf16.gmra.mxu3 %vm4632_vm7, %v3531_v32  ;;  %v2425_v32 = vpop.f32.mrf.mxu0 }
 0x386   : > { %v1920_v8 = vpop.f32.mrf.mxu3 }
 0x387   : > { %v5019_v48 = vadd.f32 %v1920_v8, %v4923_v45  ;;  %v2286_v40 = vpop.f32.mrf.mxu2  ;;  %v2039_v41 = vpop.f32.mrf.mxu1 }
 0x388   : > { %v2320_v3 = vadd.f32 %v2286_v40, %v2071_v0  ;;  %v2072_v49 = vadd.f32 %v2039_v41, %v4966_v59 }
 0x38e   : > { %v1922_v54 = vpop.f32.mrf.mxu3 }
 0x38f   : > { %v5031_v45 = vadd.f32 %v1922_v54, %v4947_v17  ;;  %v2288_v4 = vpop.f32.mrf.mxu2  ;;  %v2067_v17 = vadd.f32 %v2027_v42, %v4878_v56  ;;  %v2042_v8 = vpop.f32.mrf.mxu1 }
 0x390   : > { %v2428_v54 = vpop.f32.mrf.mxu0  ;;  %v2321_v47 = vadd.f32 %v2288_v4, %v2072_v49  ;;  %v2073_v40 = vadd.f32 %v2042_v8, %v4973_v37 }
 0x391   : > { %v2316_v26 = vadd.f32 %v2276_v10, %v2067_v17 }
 0x392   : > { %v2458_v17 = vadd.f32 %v2425_v32, %v2321_v47 }
 0x393   : > { %3535 = vmatmul.msk.bf16.gmra.mxu3 %vm4681_vm1, %v3534_v7  ;;  %v2453_v50 = vadd.f32 %v2413_v31, %v2316_v26  ;;  %v2456_v31 = vadd.f32 %v2420_v6, %v2319_v35 }
 0x396   : > { %v1925_v53 = vpop.f32.mrf.mxu3 }
 0x397   : > { %v5036_v24 = vadd.f32 %v1925_v53, %v4961_v62  ;;  %v5045_v62 = vld [vmem:[%s5142_s5] ss:$0 sm:$0xff]  ;;  %v2291_v9 = vpop.f32.mrf.mxu2  ;;  %v2457_v53 = vadd.f32 %v2423_v19, %v2320_v3 }
 0x398   : > { %v2430_v26 = vpop.f32.mrf.mxu0  ;;  %v2322_v59 = vadd.f32 %v2291_v9, %v2073_v40 }
 0x39e   : > { %v1927_v15 = vpop.f32.mrf.mxu3 }
 0x39f   : > { %v5038_v43 = vadd.f32 %v1927_v15, %v1808_v16  ;;  %v2454_v16 = vadd.f32 %v2415_v11, %v2317_v14  ;;  %v2293_v23 = vpop.f32.mrf.mxu2  ;;  %v2044_v11 = vpop.f32.mrf.mxu1 }
 0x3a0   : > { %v2074_v4 = vadd.f32 %v2044_v11, %v4979_v18 }
 0x3a2   : > { %v2323_v19 = vadd.f32 %v2293_v23, %v2074_v4 }
 0x3a4   : > { %v2460_v29 = vadd.f32 %v2430_v26, %v2323_v19 }
 0x3a6   : > { %v2550_v38 = vpop.f32.mrf.mxu3 }
 0x3a7   : > { %v2590_v58 = vadd.f32 %v2550_v38, %v2453_v50  ;;  %v2296_v44 = vpop.f32.mrf.mxu2  ;;  %v2047_v51 = vpop.f32.mrf.mxu1 }
 0x3a8   : > { %v2075_v9 = vadd.f32 %v2047_v51, %v4984_v30 }
 0x3a9   : > { %v2610_v12 = vadd.f32 %v5045_v62, %v2590_v58 }
 0x3aa   : > { %v2324_v35 = vadd.f32 %v2296_v44, %v2075_v9 }
 0x3ab   : > { %v2626_v10 = vmax.f32 %v2610_v12, 0.0  ;;  %v2433_v12 = vpop.f32.mrf.mxu0 }
 0x3ae   : > { %v2552_v22 = vpop.f32.mrf.mxu3 }
 0x3af   : > { %v2591_v56 = vadd.f32 %v2552_v22, %v2454_v16  ;;  %v2298_v55 = vpop.f32.mrf.mxu2 }
 0x3b1   : > { %v2611_v21 = vadd.f32 %v5045_v62, %v2591_v56  ;;  %v2459_v56 = vadd.f32 %v2428_v54, %v2322_v59 }
 0x3b3   : > { %v2627_v33 = vmax.f32 %v2611_v21, 0.0  ;;  %v2049_v21 = vpop.f32.mrf.mxu1 }
 0x3b4   : > { %v2076_v23 = vadd.f32 %v2049_v21, %v4996_v25 }
 0x3b5   : > { %v2642_v60 = vpack.c.bf16 %v2627_v33, %v2626_v10 }
 0x3b6   : > { %v2555_v57 = vpop.f32.mrf.mxu3 }
 0x3b7   : > { %2726 = vmatmul.bf16.vlgmr.msrb.gmra.mxu1 %v2642_v60  ;;  %v2592_v42 = vadd.f32 %v2555_v57, %v2455_v52  ;;  %v2301_v58 = vpop.f32.mrf.mxu2  ;;  %v2435_v57 = vpop.f32.mrf.mxu0 }
 0x3b9   : > { %v2612_v61 = vadd.f32 %v5045_v62, %v2592_v42 }
 0x3bb   : > { %v2628_v34 = vmax.f32 %v2612_v61, 0.0  ;;  %v2052_v18 = vpop.f32.mrf.mxu1 }
 0x3bc   : > { %v2077_v44 = vadd.f32 %v2052_v18, %v5001_v63 }
 0x3be   : > { %v2557_v36 = vpop.f32.mrf.mxu3  ;;  %v2326_v25 = vadd.f32 %v2301_v58, %v2077_v44 }
 0x3bf   : > { %v2593_v46 = vadd.f32 %v2557_v36, %v2456_v31  ;;  %v2303_v10 = vpop.f32.mrf.mxu2  ;;  %v2461_v31 = vadd.f32 %v2433_v12, %v2324_v35  ;;  %v2325_v36 = vadd.f32 %v2298_v55, %v2076_v23 }
 0x3c1   : > { %v2613_v28 = vadd.f32 %v5045_v62, %v2593_v46  ;;  %v2438_v46 = vpop.f32.mrf.mxu0 }
 0x3c3   : > { %v2629_v20 = vmax.f32 %v2613_v28, 0.0  ;;  %v2462_v28 = vadd.f32 %v2435_v57, %v2325_v36  ;;  %v2054_v0 = vpop.f32.mrf.mxu1 }
 0x3c4   : > { %v2078_v47 = vadd.f32 %v2054_v0, %v5014_v13 }
 0x3c5   : > { %v2643_v7 = vpack.c.bf16 %v2629_v20, %v2628_v34 }
 0x3c6   : > { %v2560_v27 = vpop.f32.mrf.mxu3 }
 0x3c7   : > { %2731 = vmatmul.bf16.gmra.mxu1 %v2643_v7  ;;  %v2594_v15 = vadd.f32 %v2560_v27, %v2457_v53  ;;  %v2306_v8 = vpop.f32.mrf.mxu2 }
 0x3c9   : > { %v2614_v38 = vadd.f32 %v5045_v62, %v2594_v15  ;;  %v2440_v49 = vpop.f32.mrf.mxu0  ;;  %v2463_v15 = vadd.f32 %v2438_v46, %v2326_v25 }
 0x3cb   : > { %v2630_v50 = vmax.f32 %v2614_v38, 0.0  ;;  %v2057_v55 = vpop.f32.mrf.mxu1 }
 0x3ce   : > { %v2562_v6 = vpop.f32.mrf.mxu3 }
 0x3cf   : > { %v2595_v39 = vadd.f32 %v2562_v6, %v2458_v17  ;;  %v2308_v3 = vpop.f32.mrf.mxu2  ;;  %v2327_v17 = vadd.f32 %v2303_v10, %v2078_v47 }
 0x3d1   : > { %v2615_v2 = vadd.f32 %v5045_v62, %v2595_v39  ;;  %v2464_v38 = vadd.f32 %v2440_v49, %v2327_v17  ;;  %v2443_v63 = vpop.f32.mrf.mxu0  ;;  %v5233_v17 = vld [vmem:[#allocation13_spill] sm:$0xff] }
 0x3d3   : > { %v2631_v14 = vmax.f32 %v2615_v2, 0.0 }
 0x3d5   : > { %v2644_v16 = vpack.c.bf16 %v2631_v14, %v2630_v50  ;;  %v2059_v50 = vpop.f32.mrf.mxu1  ;;  %v2079_v14 = vadd.f32 %v2057_v55, %v5019_v48 }
 0x3d6   : > { %v2565_v22 = vpop.f32.mrf.mxu3  ;;  %v2080_v12 = vadd.f32 %v2059_v50, %v5031_v45 }
 0x3d7   : > { %2736 = vmatmul.bf16.gmra.mxu1 %v2644_v16  ;;  %v2596_v41 = vadd.f32 %v2565_v22, %v2459_v56  ;;  %v2311_v6 = vpop.f32.mrf.mxu2  ;;  %v2328_v13 = vadd.f32 %v2306_v8, %v2079_v14 }
 0x3d8   : > { %v2329_v19 = vadd.f32 %v2308_v3, %v2080_v12  ;;  %v5232_v3 = vld [vmem:[#allocation12_spill] sm:$0xff] }
 0x3d9   : > { %v2616_v5 = vadd.f32 %v5045_v62, %v2596_v41  ;;  %v2465_v56 = vadd.f32 %v2443_v63, %v2328_v13  ;;  %v2445_v21 = vpop.f32.mrf.mxu0  ;;  %v2767_v44 = vunpack.c.l.bf16 %v5232_v3 }
 0x3da   : > { %v2466_v10 = vadd.f32 %v2445_v21, %v2329_v19 }
 0x3db   : > { %v2632_v1 = vmax.f32 %v2616_v5, 0.0 }
 0x3de   : > { %v2567_v33 = vpop.f32.mrf.mxu3 }
 0x3df   : > { %v2597_v37 = vadd.f32 %v2567_v33, %v2460_v29  ;;  %v2313_v22 = vpop.f32.mrf.mxu2  ;;  %v2062_v29 = vpop.f32.mrf.mxu1 }
 0x3e1   : > { %v2617_v60 = vadd.f32 %v5045_v62, %v2597_v37 }
 0x3e3   : > { %v2633_v52 = vmax.f32 %v2617_v60, 0.0 }
 0x3e5   : > { %v2645_v32 = vpack.c.bf16 %v2633_v52, %v2632_v1  ;;  %v2081_v1 = vadd.f32 %v2062_v29, %v5036_v24 }
 0x3e6   : > { %v2570_v42 = vpop.f32.mrf.mxu3 }
 0x3e7   : > { %2741 = vmatmul.bf16.gmra.mxu1 %v2645_v32  ;;  %v2598_v61 = vadd.f32 %v2570_v42, %v2461_v31  ;;  %v2448_v48 = vpop.f32.mrf.mxu2  ;;  %v2064_v45 = vpop.f32.mrf.mxu1  ;;  %v2330_v35 = vadd.f32 %v2311_v6, %v2081_v1  ;;  %v2770_v6 = vunpack.c.h.bf16 %v5233_v17 }
 0x3e8   : > { %v2082_v32 = vadd.f32 %v2064_v45, %v5038_v43  ;;  %v5080_v43 = vld [vmem:[%s5144_s7] ss:$0 sm:$0xff] }
 0x3e9   : > { %v2618_v20 = vadd.f32 %v5045_v62, %v2598_v61  ;;  %v2467_v42 = vadd.f32 %v2448_v48, %v2330_v35 }
 0x3ea   : > { %v2331_v8 = vadd.f32 %v2313_v22, %v2082_v32  ;;  %v5236_v32 = vld [vmem:[#allocation16_spill] sm:$0xff] }
 0x3eb   : > { %v2634_v7 = vmax.f32 %v2618_v20, 0.0 }
 0x3ee   : > { %v2572_v34 = vpop.f32.mrf.mxu3 }
 0x3ef   : > { %v2599_v30 = vadd.f32 %v2572_v34, %v2462_v28  ;;  %v2450_v23 = vpop.f32.mrf.mxu2 }
 0x3f0   : > { %v2468_v36 = vadd.f32 %v2450_v23, %v2331_v8  ;;  %v2776_v23 = vunpack.c.h.bf16 %v5236_v32 }
 0x3f1   : > { %v2619_v54 = vadd.f32 %v5045_v62, %v2599_v30 }
 0x3f3   : > { %v2635_v11 = vmax.f32 %v2619_v54, 0.0 }
 0x3f5   : > { %v2646_v27 = vpack.c.bf16 %v2635_v11, %v2634_v7  ;;  %v2768_v7 = vunpack.c.h.bf16 %v5232_v3 }
 0x3f6   : > { %v2575_v53 = vpop.f32.mrf.mxu3 }
 0x3f7   : > { %2746 = vmatmul.bf16.gmra.mxu1 %v2646_v27  ;;  %v2600_v26 = vadd.f32 %v2575_v53, %v2463_v15 }
 0x3f9   : > { %v2620_v51 = vadd.f32 %v5045_v62, %v2600_v26  ;;  %v2769_v26 = vunpack.c.l.bf16 %v5233_v17 }
 0x3fb   : > { %v2636_v58 = vmax.f32 %v2620_v51, 0.0 }
 0x3fe   : > { %v2577_v39 = vpop.f32.mrf.mxu3 }
 0x3ff   : > { %v2601_v2 = vadd.f32 %v2577_v39, %v2464_v38 }
 0x401   : > { %v2621_v40 = vadd.f32 %v5045_v62, %v2601_v2 }
 0x403   : > { %v2637_v59 = vmax.f32 %v2621_v40, 0.0 }
 0x405   : > { %v2647_v16 = vpack.c.bf16 %v2637_v59, %v2636_v58  ;;  %v5234_v59 = vld [vmem:[#allocation14_spill] sm:$0xff] }
 0x406   : > { %v2580_v4 = vpop.f32.mrf.mxu3  ;;  %v2771_v13 = vunpack.c.l.bf16 %v5234_v59 }
 0x407   : > { %2751 = vmatmul.bf16.gmra.mxu1 %v2647_v16  ;;  %v2602_v41 = vadd.f32 %v2580_v4, %v2465_v56  ;;  %v2772_v16 = vunpack.c.h.bf16 %v5234_v59 }
 0x409   : > { %v2622_v5 = vadd.f32 %v5045_v62, %v2602_v41 }
 0x40b   : > { %v2638_v57 = vmax.f32 %v2622_v5, 0.0 }
 0x40e   : > { %v2582_v33 = vpop.f32.mrf.mxu3 }
 0x40f   : > { %v2603_v37 = vadd.f32 %v2582_v33, %v2466_v10  ;;  %v5235_v33 = vld [vmem:[#allocation15_spill] sm:$0xff] }
 0x410   : > { %v2773_v5 = vunpack.c.l.bf16 %v5235_v33 }
 0x411   : > { %v2623_v60 = vadd.f32 %v5045_v62, %v2603_v37  ;;  %v2774_v37 = vunpack.c.h.bf16 %v5235_v33 }
 0x413   : > { %v2639_v9 = vmax.f32 %v2623_v60, 0.0 }
 0x415   : > { %v2648_v52 = vpack.c.bf16 %v2639_v9, %v2638_v57 }
 0x416   : > { %v2585_v18 = vpop.f32.mrf.mxu3 }
 0x417   : > { %2756 = vmatmul.bf16.gmra.mxu1 %v2648_v52  ;;  %v2604_v31 = vadd.f32 %v2585_v18, %v2467_v42  ;;  %v2775_v42 = vunpack.c.l.bf16 %v5236_v32 }
 0x419   : > { %v2624_v46 = vadd.f32 %v5045_v62, %v2604_v31 }
 0x41b   : > { %v2640_v34 = vmax.f32 %v2624_v46, 0.0 }
 0x41e   : > { %v2587_v61 = vpop.f32.mrf.mxu3 }
 0x41f   : > { %v2605_v28 = vadd.f32 %v2587_v61, %v2468_v36 }
 0x421   : > { %v2625_v0 = vadd.f32 %v5045_v62, %v2605_v28 }
 0x423   : > { %v2641_v24 = vmax.f32 %v2625_v0, 0.0 }
 0x425   : > { %v2649_v20 = vpack.c.bf16 %v2641_v24, %v2640_v34 }
 0x427   : > { %2761 = vmatmul.bf16.gmra.mxu1 %v2649_v20  ;;  %v5237_v20 = vld [vmem:[#allocation17_spill] sm:$0xff] }
 0x434   : > { %v2727_v30 = vpop.f32.mrf.mxu1 }
 0x435   : > { %v2728_v54 = vadd.f32 %v5080_v43, %v2727_v30  ;;  %v2777_v30 = vunpack.c.l.bf16 %v5237_v20 }
 0x437   : > { %v2783_v25 = vadd.f32 %v2767_v44, %v2728_v54  ;;  %v2778_v54 = vunpack.c.h.bf16 %v5237_v20 }
 0x439   : > { %v2799_v49 = vmax.f32 %v2783_v25, 0.0 }
 0x43c   : > { %v2729_v11 = vpop.f32.mrf.mxu1 }
 0x43d   : > { %v2730_v62 = vadd.f32 %v5080_v43, %v2729_v11 }
 0x43f   : > { %v2784_v27 = vadd.f32 %v2768_v7, %v2730_v62 }
 0x441   : > { %v2800_v53 = vmax.f32 %v2784_v27, 0.0 }
 0x443   : > { %v3683_v47 = vpack.c.bf16 %v2800_v53, %v2799_v49 }
 0x444   : > { %v2732_v55 = vpop.f32.mrf.mxu1 }
 0x445   : > { %3684 = vst [vmem:[%s3928_s11] sm:$0xff] %v3683_v47   ;;  %v2733_v15 = vadd.f32 %v5080_v43, %v2732_v55  ;;  %v5238_v47 = vld [vmem:[#allocation18_spill] sm:$0xff] }
 0x446   : > { %v2779_v55 = vunpack.c.l.bf16 %v5238_v47 }
 0x447   : > { %v2785_v39 = vadd.f32 %v2769_v26, %v2733_v15  ;;  %v2780_v15 = vunpack.c.h.bf16 %v5238_v47 }
 0x449   : > { %v2801_v63 = vmax.f32 %v2785_v39, 0.0 }
 0x44c   : > { %v2734_v38 = vpop.f32.mrf.mxu1 }
 0x44d   : > { %v2735_v51 = vadd.f32 %v5080_v43, %v2734_v38 }
 0x44f   : > { %v2786_v2 = vadd.f32 %v2770_v6, %v2735_v51 }
 0x451   : > { %v2802_v40 = vmax.f32 %v2786_v2, 0.0 }
 0x453   : > { %v3688_v50 = vpack.c.bf16 %v2802_v40, %v2801_v63 }
 0x454   : > { %v2737_v14 = vpop.f32.mrf.mxu1 }
 0x455   : > { %3720 = vst [vmem:[%s3928_s11 + $0x8] sm:$0xff] %v3688_v50   ;;  %v2738_v58 = vadd.f32 %v5080_v43, %v2737_v14  ;;  %v5239_v50 = vld [vmem:[#allocation19_spill] sm:$0xff] }
 0x456   : > { %v2781_v14 = vunpack.c.l.bf16 %v5239_v50 }
 0x457   : > { %v2787_v4 = vadd.f32 %v2771_v13, %v2738_v58  ;;  %v2782_v58 = vunpack.c.h.bf16 %v5239_v50 }
 0x459   : > { %v2803_v19 = vmax.f32 %v2787_v4, 0.0 }
 0x45c   : > { %v2739_v22 = vpop.f32.mrf.mxu1 }
 0x45d   : > { %v2740_v12 = vadd.f32 %v5080_v43, %v2739_v22 }
 0x45f   : > { %v2788_v56 = vadd.f32 %v2772_v16, %v2740_v12 }
 0x461   : > { %v2804_v21 = vmax.f32 %v2788_v56, 0.0 }
 0x463   : > { %v3693_v41 = vpack.c.bf16 %v2804_v21, %v2803_v19 }
 0x464   : > { %v2742_v29 = vpop.f32.mrf.mxu1 }
 0x465   : > { %3721 = vst [vmem:[%s3928_s11 + $0x10] sm:$0xff] %v3693_v41   ;;  %v2743_v10 = vadd.f32 %v5080_v43, %v2742_v29 }
 0x467   : > { %v2789_v60 = vadd.f32 %v2773_v5, %v2743_v10 }
 0x469   : > { %v2805_v1 = vmax.f32 %v2789_v60, 0.0 }
 0x46c   : > { %v2744_v48 = vpop.f32.mrf.mxu1 }
 0x46d   : > { %v2745_v57 = vadd.f32 %v5080_v43, %v2744_v48 }
 0x46f   : > { %v2790_v9 = vadd.f32 %v2774_v37, %v2745_v57 }
 0x471   : > { %v2806_v52 = vmax.f32 %v2790_v9, 0.0 }
 0x473   : > { %v3698_v45 = vpack.c.bf16 %v2806_v52, %v2805_v1 }
 0x474   : > { %v2747_v18 = vpop.f32.mrf.mxu1 }
 0x475   : > { %3722 = vst [vmem:[%s3928_s11 + $0x18] sm:$0xff] %v3698_v45   ;;  %v2748_v35 = vadd.f32 %v5080_v43, %v2747_v18 }
 0x477   : > { %v2791_v31 = vadd.f32 %v2775_v42, %v2748_v35 }
 0x479   : > { %v2807_v46 = vmax.f32 %v2791_v31, 0.0 }
 0x47c   : > { %v2749_v8 = vpop.f32.mrf.mxu1 }
 0x47d   : > { %v2750_v36 = vadd.f32 %v5080_v43, %v2749_v8 }
 0x47f   : > { %v2792_v61 = vadd.f32 %v2776_v23, %v2750_v36 }
 0x481   : > { %v2808_v28 = vmax.f32 %v2792_v61, 0.0 }
 0x483   : > { %v3703_v0 = vpack.c.bf16 %v2808_v28, %v2807_v46 }
 0x484   : > { %v2752_v34 = vpop.f32.mrf.mxu1 }
 0x485   : > { %3723 = vst [vmem:[%s3928_s11 + $0x20] sm:$0xff] %v3703_v0   ;;  %v2753_v24 = vadd.f32 %v5080_v43, %v2752_v34 }
 0x487   : > { %v2793_v44 = vadd.f32 %v2777_v30, %v2753_v24 }
 0x489   : > { %v2809_v25 = vmax.f32 %v2793_v44, 0.0 }
 0x48c   : > { %v2754_v3 = vpop.f32.mrf.mxu1 }
 0x48d   : > { %v2755_v7 = vadd.f32 %v5080_v43, %v2754_v3 }
 0x48f   : > { %v2794_v11 = vadd.f32 %v2778_v54, %v2755_v7 }
 0x491   : > { %v2810_v62 = vmax.f32 %v2794_v11, 0.0 }
 0x493   : > { %v3708_v27 = vpack.c.bf16 %v2810_v62, %v2809_v25 }
 0x494   : > { %v2757_v49 = vpop.f32.mrf.mxu1 }
 0x495   : > { %3724 = vst [vmem:[%s3928_s11 + $0x28] sm:$0xff] %v3708_v27   ;;  %v2758_v53 = vadd.f32 %v5080_v43, %v2757_v49 }
 0x497   : > { %v2795_v26 = vadd.f32 %v2779_v55, %v2758_v53 }
 0x499   : > { %v2811_v39 = vmax.f32 %v2795_v26, 0.0 }
 0x49c   : > { %v2759_v17 = vpop.f32.mrf.mxu1 }
 0x49d   : > { %v2760_v6 = vadd.f32 %v5080_v43, %v2759_v17 }
 0x49f   : > { %v2796_v38 = vadd.f32 %v2780_v15, %v2760_v6 }
 0x4a1   : > { %v2812_v51 = vmax.f32 %v2796_v38, 0.0 }
 0x4a3   : > { %v3713_v2 = vpack.c.bf16 %v2812_v51, %v2811_v39 }
 0x4a4   : > { %v2762_v63 = vpop.f32.mrf.mxu1 }
 0x4a5   : > { %3725 = vst [vmem:[%s3928_s11 + $0x30] sm:$0xff] %v3713_v2   ;;  %v2763_v40 = vadd.f32 %v5080_v43, %v2762_v63 }
 0x4a7   : > { %v2797_v13 = vadd.f32 %v2781_v14, %v2763_v40 }
 0x4a9   : > { %v2813_v4 = vmax.f32 %v2797_v13, 0.0 }
 0x4ac   : > { %v2764_v59 = vpop.f32.mrf.mxu1 }
 0x4ad   : > { %v2765_v16 = vadd.f32 %v5080_v43, %v2764_v59 }
 0x4af   : > { %v2798_v22 = vadd.f32 %v2782_v58, %v2765_v16 }
 0x4b1   : > { %v2814_v12 = vmax.f32 %v2798_v22, 0.0 }
 0x4b3   : > { %v3718_v56 = vpack.c.bf16 %v2814_v12, %v2813_v4 }
 0x4b5   : > { %3726 = vst [vmem:[%s3928_s11 + $0x38] sm:$0xff] %v3718_v56  }
 0x4b6 PF: > { %s18_s9 = sadd.s32 1, %s3832_s9   ;;  %s5240_s17 = sld [smem:[#allocation10_spill]] }
 0x4b7   : > { %p15_p11 = scmp.ge.s32.totalorder %s18_s9, 6   ;;  %s5241_s19 = sld [smem:[#allocation11_spill]] }
 0x4b8   : > { %s5242_s27 = smov %s3824_s29  ;;  %s5243_s28 = smov %s3828_s30 }
 0x4b9   :  { %17 = sbr.rel (!%p15_p11) target bundleno = 3 (0x3), region = 166 }
 0x4bc   : > { %s5244_s29 = smov %s5240_s17 }
 0x4bd   : > { %s5245_s30 = smov %s5241_s19 }
 0x4be   :  { %2879 = vsyncmov [#allocation5] }
 0x4c1   :  { %s2880_s11 = vpop.sfrf %2879 }
 0x4c2   :  { %p3570_p12 = scmp.ne.s32.totalorder %s2880_s11, 0 }
 0x4c4   :  { %2884 = shalt.err (%p3570_p12)  }
 0x4c5   :  { %2886 = vsyncmov [#allocation5 + $0x1] }
 0x4c8   :  { %s2887_s22 = vpop.sfrf %2886 }
 0x4c9   :  { %p3571_p13 = scmp.ne.s32.totalorder %s2887_s22, 0 }
 0x4cb   :  { %2891 = shalt.err (%p3571_p13)  }

</bundles_post_ra>
